<compile_context>
chip_gen: v5e
topology: v5e:2x2
jax: 0.10.0
libtpu: 0.0.40
codegen_flags: <defaults>
</compile_context>

<pallas_src>
import math

import jax
import jax.numpy as jnp
from jax.experimental import pallas as pl
from jax.experimental.pallas import tpu as pltpu


LATENT_DIM = 64
NUM_CLASSES = 10
IN_DIM = LATENT_DIM + NUM_CLASSES   # 74
IN_PAD = 128                        # lane-dense, exactly one 128-deep MXU pass
HIDDEN_1 = 512
HIDDEN_2 = 256
OUT_DIM = 28 * 28                   # 784 = 6*128 + 16 (last chunk masked store)
MAX_TILE_B = 1024                   # big tiles on v5e/v6e; VMEM-checked below


def _round_up(x, m):
    return ((x + m - 1) // m) * m


def _cdiv(a, b):
    return -(-a // b)


def _mlp_decoder_kernel(x_ref, w1_ref, b1_ref, w2_ref, b2_ref, w3_ref, b3_ref,
                        o_ref):
    # fc1: Linear(74 -> 512) + ReLU, as a single lane-dense K=128 matmul
    # (input and w1 zero-padded 74 -> 128 in the wrapper).
    h1 = (jnp.dot(x_ref[...], w1_ref[...], preferred_element_type=jnp.float32)
          + b1_ref[...])
    h1 = jnp.maximum(h1, 0.0).astype(jnp.bfloat16)

    # fc2: Linear(512 -> 256) + ReLU
    h2 = (jnp.dot(h1, w2_ref[...], preferred_element_type=jnp.float32)
          + b2_ref[...])
    h2 = jnp.maximum(h2, 0.0).astype(jnp.bfloat16)

    # fc3: Linear(256 -> 784) + Sigmoid.
    logits = (jnp.dot(h2, w3_ref[...], preferred_element_type=jnp.float32)
              + b3_ref[...])
    # sigmoid(x) = 0.5 * (tanh(x/2) + 1): one EUP transcendental per element.
    o_ref[...] = (0.5 * (jnp.tanh(0.5 * logits) + 1.0)).astype(o_ref.dtype)


def init_params(key):
    """Deterministic init mimicking torch.nn.Linear defaults:
    U(-1/sqrt(fan_in), 1/sqrt(fan_in)). Weights stored (in, out) so the kernel
    does x @ W (equivalent to PyTorch's x @ W.T). f32 master copy."""
    dims = [(IN_DIM, HIDDEN_1), (HIDDEN_1, HIDDEN_2), (HIDDEN_2, OUT_DIM)]
    params = []
    for fan_in, fan_out in dims:
        key, kw, kb = jax.random.split(key, 3)
        bound = 1.0 / math.sqrt(fan_in)
        w = jax.random.uniform(kw, (fan_in, fan_out), jnp.float32,
                               minval=-bound, maxval=bound)
        b = jax.random.uniform(kb, (1, fan_out), jnp.float32,
                               minval=-bound, maxval=bound)
        params.extend([w, b])
    return tuple(params)


def prepare_kernel_params(params):
    """Zero-pad w1 to K=128 (concat fused into one lane-dense matmul) and
    cast weights to bf16 (biases stay f32)."""
    w1, b1, w2, b2, w3, b3 = params
    w1_p = jnp.pad(w1, ((0, IN_PAD - IN_DIM), (0, 0))).astype(jnp.bfloat16)
    return (w1_p, b1, w2.astype(jnp.bfloat16), b2,
            w3.astype(jnp.bfloat16), b3)


def _choose_tiles(B):
    """tile_b multiple of 8; >= 2 (even) tiles when B > 8 so both v7x
    TensorCores get work; per-tile rows capped at MAX_TILE_B."""
    B8 = _round_up(max(B, 1), 8)
    if B8 <= 8:
        return B8, 1
    n_tiles = max(2, _cdiv(B8, MAX_TILE_B))
    if n_tiles % 2:
        n_tiles += 1
    tile_b = _round_up(_cdiv(B8, n_tiles), 8)
    return tile_b, n_tiles


def mlp_decoder_forward(z, c, kparams, out_dtype=jnp.float32):
    """Pallas equivalent of MLPDecoder.forward(z, c) -> (B, 1, 28, 28).
    out_dtype=jnp.bfloat16 halves output HBM writeback if the consumer
    tolerates it; default f32 matches the PyTorch module."""
    w1, b1, w2, b2, w3, b3 = kparams
    B = z.shape[0]

    tile_b, n_tiles = _choose_tiles(B)
    B_pad = tile_b * n_tiles

    # Fused concat + pad to the lane-dense K=128 input slab (tiny vs output).
    zc = jnp.concatenate([z, c], axis=1).astype(jnp.bfloat16)
    zc = jnp.pad(zc, ((0, B_pad - B), (0, IN_PAD - IN_DIM)))

    def row_spec(width):
        return pl.BlockSpec((tile_b, width), lambda i: (i, 0))

    def pinned_spec(shape):
        # Same block for every grid step -> DMA'd once, resident in VMEM.
        return pl.BlockSpec(shape, lambda i: (0, 0))

    out_bytes = jnp.dtype(out_dtype).itemsize
    flops = 2 * B_pad * (IN_PAD * HIDDEN_1 + HIDDEN_1 * HIDDEN_2
                         + HIDDEN_2 * OUT_DIM)
    weight_bytes = 2 * (IN_PAD * HIDDEN_1 + HIDDEN_1 * HIDDEN_2
                        + HIDDEN_2 * OUT_DIM)
    bias_bytes = 4 * (HIDDEN_1 + HIDDEN_2 + OUT_DIM)
    io_bytes = B_pad * (IN_PAD * 2 + OUT_DIM * out_bytes)
    cost = pl.CostEstimate(flops=flops,
                           transcendentals=B_pad * OUT_DIM,
                           bytes_accessed=weight_bytes + bias_bytes + io_bytes)

    flat = pl.pallas_call(
        _mlp_decoder_kernel,
        out_shape=jax.ShapeDtypeStruct((B_pad, OUT_DIM), out_dtype),
        grid=(n_tiles,),
        in_specs=[
            row_spec(IN_PAD),
            pinned_spec(w1.shape), pinned_spec(b1.shape),
            pinned_spec(w2.shape), pinned_spec(b2.shape),
            pinned_spec(w3.shape), pinned_spec(b3.shape),
        ],
        out_specs=row_spec(OUT_DIM),
        compiler_params=pltpu.CompilerParams(
            dimension_semantics=("parallel",),
            vmem_limit_bytes=48 * 1024 * 1024),
        cost_estimate=cost,
    )(zc, w1, b1, w2, b2, w3, b3)

    if B_pad != B:
        flat = flat[:B]           # only batch-pad rows; no lane depad needed
    return flat.reshape(-1, 1, 28, 28)


def _reference_forward_f32(z, c, params):
    """Pure-f32 reference (PyTorch semantics)."""
    w1, b1, w2, b2, w3, b3 = params
    zc = jnp.concatenate([z, c], axis=1)
    h1 = jax.nn.relu(zc @ w1 + b1)
    h2 = jax.nn.relu(h1 @ w2 + b2)
    out = jax.nn.sigmoid(h2 @ w3 + b3)
    return out.reshape(-1, 1, 28, 28)


def _reference_forward_bf16(z, c, params):
    """Reference that mimics the kernel's bf16-weight numerics."""
    w1, b1, w2, b2, w3, b3 = params
    zc = jnp.concatenate([z, c], axis=1).astype(jnp.bfloat16)
    h1 = jnp.dot(zc, w1.astype(jnp.bfloat16),
                 preferred_element_type=jnp.float32) + b1
    h1 = jnp.maximum(h1, 0.0).astype(jnp.bfloat16)
    h2 = jnp.dot(h1, w2.astype(jnp.bfloat16),
                 preferred_element_type=jnp.float32) + b2
    h2 = jnp.maximum(h2, 0.0).astype(jnp.bfloat16)
    out = jax.nn.sigmoid(jnp.dot(h2, w3.astype(jnp.bfloat16),
                                 preferred_element_type=jnp.float32) + b3)
    return out.reshape(-1, 1, 28, 28)


if __name__ == "__main__":
    key = jax.random.PRNGKey(0)
    kp, kz, kc = jax.random.split(key, 3)

    params = init_params(kp)
    kparams = prepare_kernel_params(params)

    B = 8
    z = jax.random.normal(kz, (B, LATENT_DIM), jnp.float32)
    labels = jax.random.randint(kc, (B,), 0, NUM_CLASSES)
    c = jax.nn.one_hot(labels, NUM_CLASSES, dtype=jnp.float32)

    out = jax.block_until_ready(mlp_decoder_forward(z, c, kparams))
    assert out.shape == (B, 1, 28, 28), out.shape

    # Tight check vs. a reference following the kernel's bf16 path.
    ref_bf16 = _reference_forward_bf16(z, c, params)
    assert jnp.allclose(out, ref_bf16, atol=1e-2, rtol=1e-2), \
        float(jnp.max(jnp.abs(out - ref_bf16)))

    # Looser check vs. pure f32 (PyTorch-equivalent) semantics.
    ref_f32 = _reference_forward_f32(z, c, params)
    assert jnp.allclose(out, ref_f32, atol=3e-2, rtol=3e-2), \
        float(jnp.max(jnp.abs(out - ref_f32)))

    print("KERNEL_OK")
</pallas_src>

<mosaic_0001>
module attributes {stable_mosaic.version = 11 : i64} {
  func.func @_mlp_decoder_kernel(%arg0: i32, %arg1: memref<8x128xbf16, #tpu.memory_space<vmem>>, %arg2: memref<128x512xbf16, #tpu.memory_space<vmem>>, %arg3: memref<1x512xf32, #tpu.memory_space<vmem>>, %arg4: memref<512x256xbf16, #tpu.memory_space<vmem>>, %arg5: memref<1x256xf32, #tpu.memory_space<vmem>>, %arg6: memref<256x784xbf16, #tpu.memory_space<vmem>>, %arg7: memref<1x784xf32, #tpu.memory_space<vmem>>, %arg8: memref<8x784xf32, #tpu.memory_space<vmem>>) attributes {dimension_semantics = [#tpu.dimension_semantics<parallel>], iteration_bounds = array<i64: 1>, scalar_prefetch = 0 : i64, scratch_operands = 0 : i64, tpu.core_type = #tpu.core_type<tc>, window_params = [{transform_indices = @transform_0, window_bounds = array<i64: 8, 128>}, {pipeline_mode = #tpu.pipeline_mode<synchronous>, transform_indices = @transform_1, window_bounds = array<i64: 128, 512>}, {pipeline_mode = #tpu.pipeline_mode<synchronous>, transform_indices = @transform_2, window_bounds = array<i64: 1, 512>}, {pipeline_mode = #tpu.pipeline_mode<synchronous>, transform_indices = @transform_3, window_bounds = array<i64: 512, 256>}, {pipeline_mode = #tpu.pipeline_mode<synchronous>, transform_indices = @transform_4, window_bounds = array<i64: 1, 256>}, {pipeline_mode = #tpu.pipeline_mode<synchronous>, transform_indices = @transform_5, window_bounds = array<i64: 256, 784>}, {pipeline_mode = #tpu.pipeline_mode<synchronous>, transform_indices = @transform_6, window_bounds = array<i64: 1, 784>}, {transform_indices = @transform_7, window_bounds = array<i64: 8, 784>}]} {
    %c0 = arith.constant 0 : index
    %c0_0 = arith.constant 0 : index
    %0 = vector.load %arg1[%c0, %c0_0] : memref<8x128xbf16, #tpu.memory_space<vmem>>, vector<8x128xbf16>
    %c0_1 = arith.constant 0 : index
    %c0_2 = arith.constant 0 : index
    %1 = vector.load %arg2[%c0_1, %c0_2] : memref<128x512xbf16, #tpu.memory_space<vmem>>, vector<128x512xbf16>
    %cst = arith.constant dense<0.000000e+00> : vector<8x512xf32>
    %2 = tpu.matmul %0, %1, %cst {dimension_numbers = #tpu.dot_dimension_numbers<[1], [0], [0], [1], [0, 0, 1, 1], [], []>} : vector<8x128xbf16>, vector<128x512xbf16>, vector<8x512xf32> -> vector<8x512xf32>
    %c0_3 = arith.constant 0 : index
    %c0_4 = arith.constant 0 : index
    %3 = vector.load %arg3[%c0_3, %c0_4] : memref<1x512xf32, #tpu.memory_space<vmem>>, vector<1x512xf32>
    %4 = vector.broadcast %3 : vector<1x512xf32> to vector<8x512xf32>
    %5 = arith.addf %2, %4 : vector<8x512xf32>
    %cst_5 = arith.constant 0.000000e+00 : f32
    %6 = vector.broadcast %cst_5 : f32 to vector<8x512xf32>
    %7 = arith.maximumf %5, %6 : vector<8x512xf32>
    %8 = arith.truncf %7 : vector<8x512xf32> to vector<8x512xbf16>
    %c0_6 = arith.constant 0 : index
    %c0_7 = arith.constant 0 : index
    %9 = vector.load %arg4[%c0_6, %c0_7] : memref<512x256xbf16, #tpu.memory_space<vmem>>, vector<512x256xbf16>
    %cst_8 = arith.constant dense<0.000000e+00> : vector<8x256xf32>
    %10 = tpu.matmul %8, %9, %cst_8 {dimension_numbers = #tpu.dot_dimension_numbers<[1], [0], [0], [1], [0, 0, 1, 1], [], []>} : vector<8x512xbf16>, vector<512x256xbf16>, vector<8x256xf32> -> vector<8x256xf32>
    %c0_9 = arith.constant 0 : index
    %c0_10 = arith.constant 0 : index
    %11 = vector.load %arg5[%c0_9, %c0_10] : memref<1x256xf32, #tpu.memory_space<vmem>>, vector<1x256xf32>
    %12 = vector.broadcast %11 : vector<1x256xf32> to vector<8x256xf32>
    %13 = arith.addf %10, %12 : vector<8x256xf32>
    %cst_11 = arith.constant 0.000000e+00 : f32
    %14 = vector.broadcast %cst_11 : f32 to vector<8x256xf32>
    %15 = arith.maximumf %13, %14 : vector<8x256xf32>
    %16 = arith.truncf %15 : vector<8x256xf32> to vector<8x256xbf16>
    %c0_12 = arith.constant 0 : index
    %c0_13 = arith.constant 0 : index
    %17 = vector.load %arg6[%c0_12, %c0_13] : memref<256x784xbf16, #tpu.memory_space<vmem>>, vector<256x784xbf16>
    %cst_14 = arith.constant dense<0.000000e+00> : vector<8x784xf32>
    %18 = tpu.matmul %16, %17, %cst_14 {dimension_numbers = #tpu.dot_dimension_numbers<[1], [0], [0], [1], [0, 0, 1, 1], [], []>} : vector<8x256xbf16>, vector<256x784xbf16>, vector<8x784xf32> -> vector<8x784xf32>
    %c0_15 = arith.constant 0 : index
    %c0_16 = arith.constant 0 : index
    %19 = vector.load %arg7[%c0_15, %c0_16] : memref<1x784xf32, #tpu.memory_space<vmem>>, vector<1x784xf32>
    %20 = vector.broadcast %19 : vector<1x784xf32> to vector<8x784xf32>
    %21 = arith.addf %18, %20 : vector<8x784xf32>
    %cst_17 = arith.constant 5.000000e-01 : f32
    %22 = vector.broadcast %cst_17 : f32 to vector<8x784xf32>
    %23 = arith.mulf %22, %21 : vector<8x784xf32>
    %24 = math.tanh %23 : vector<8x784xf32>
    %cst_18 = arith.constant 1.000000e+00 : f32
    %25 = vector.broadcast %cst_18 : f32 to vector<8x784xf32>
    %26 = arith.addf %24, %25 : vector<8x784xf32>
    %cst_19 = arith.constant 5.000000e-01 : f32
    %27 = vector.broadcast %cst_19 : f32 to vector<8x784xf32>
    %28 = arith.mulf %27, %26 : vector<8x784xf32>
    %c0_20 = arith.constant 0 : index
    %c0_21 = arith.constant 0 : index
    %29 = vector.load %arg8[%c0_20, %c0_21] : memref<8x784xf32, #tpu.memory_space<vmem>>, vector<8x784xf32>
    tpu.vector_store %arg8[%c0_20, %c0_21], %28 {strides = array<i32>} : memref<8x784xf32, #tpu.memory_space<vmem>>, vector<8x784xf32>,
    return
  }
  func.func @transform_0(%arg0: i32) -> (i32, i32) {
    %c0_i32 = arith.constant 0 : i32
    %c0_i32_0 = arith.constant 0 : i32
    return %arg0, %c0_i32 : i32, i32
  }
  func.func @transform_1(%arg0: i32) -> (i32, i32) {
    %c0_i32 = arith.constant 0 : i32
    %c0_i32_0 = arith.constant 0 : i32
    %c0_i32_1 = arith.constant 0 : i32
    return %c0_i32, %c0_i32_0 : i32, i32
  }
  func.func @transform_2(%arg0: i32) -> (i32, i32) {
    %c0_i32 = arith.constant 0 : i32
    %c0_i32_0 = arith.constant 0 : i32
    %c0_i32_1 = arith.constant 0 : i32
    return %c0_i32, %c0_i32_0 : i32, i32
  }
  func.func @transform_3(%arg0: i32) -> (i32, i32) {
    %c0_i32 = arith.constant 0 : i32
    %c0_i32_0 = arith.constant 0 : i32
    %c0_i32_1 = arith.constant 0 : i32
    return %c0_i32, %c0_i32_0 : i32, i32
  }
  func.func @transform_4(%arg0: i32) -> (i32, i32) {
    %c0_i32 = arith.constant 0 : i32
    %c0_i32_0 = arith.constant 0 : i32
    %c0_i32_1 = arith.constant 0 : i32
    return %c0_i32, %c0_i32_0 : i32, i32
  }
  func.func @transform_5(%arg0: i32) -> (i32, i32) {
    %c0_i32 = arith.constant 0 : i32
    %c0_i32_0 = arith.constant 0 : i32
    %c0_i32_1 = arith.constant 0 : i32
    return %c0_i32, %c0_i32_0 : i32, i32
  }
  func.func @transform_6(%arg0: i32) -> (i32, i32) {
    %c0_i32 = arith.constant 0 : i32
    %c0_i32_0 = arith.constant 0 : i32
    %c0_i32_1 = arith.constant 0 : i32
    return %c0_i32, %c0_i32_0 : i32, i32
  }
  func.func @transform_7(%arg0: i32) -> (i32, i32) {
    %c0_i32 = arith.constant 0 : i32
    %c0_i32_0 = arith.constant 0 : i32
    return %arg0, %c0_i32 : i32, i32
  }
}

</mosaic_0001>

<bundles_post_ra>
// kernel: tpu_custom_call.1
= control target key start
LH: loop header
LB: loop body
LE: loop exit
PB: predicated region body
PF: predicated region fallthrough
CT: control target
= control target key end

     0   :  { %s4170_s0 = inlined_call_operand.vmem [shape: bf16[8,128], index: 0, kind: input, shape index: {}]   ;;  %s4171_s1 = inlined_call_operand.vmem [shape: bf16[128,512], index: 1, kind: input, shape index: {}]   ;;  %s4172_s2 = inlined_call_operand.vmem [shape: f32[1,512], index: 2, kind: input, shape index: {}]   ;;  %s4173_s3 = inlined_call_operand.vmem [shape: bf16[512,256], index: 3, kind: input, shape index: {}]   ;;  %s4174_s4 = inlined_call_operand.vmem [shape: f32[1,256], index: 4, kind: input, shape index: {}]   ;;  %s4175_s5 = inlined_call_operand.vmem [shape: bf16[256,784], index: 5, kind: input, shape index: {}]   ;;  %s4176_s6 = inlined_call_operand.vmem [shape: f32[1,784], index: 6, kind: input, shape index: {}]   ;;  %s4177_s7 = inlined_call_operand.hbm [shape: f32[8,784], index: 7, kind: output, shape index: {}]  }
   0x1   :  { %v1856_v0 = vld [vmem:[%s4171_s1 + $0xe0] sm:$0xf]  ;;  %v2604_v1 = vld [vmem:[%s4171_s1 + $0xec] sm:$0xf0]  ;;  %v2602_v2 = vld [vmem:[%s4171_s1 + $0xe4] sm:$0xf] }
   0x2   :  { %v1857_v3 = vor.u32 %v2604_v1, %v1856_v0  ;;  %v1858_v4 = vld [vmem:[%s4171_s1 + $0xf0] sm:$0xf0]  ;;  %v1864_v5 = vld [vmem:[%s4171_s1 + $0xe8] sm:$0xf]  ;;  %v2605_v6 = vld [vmem:[%s4171_s1 + $0xf4] sm:$0xf0] }
   0x3   :  { %v1861_v7 = vor.u32 %v2602_v2, %v1858_v4  ;;  %v1865_v8 = vor.u32 %v2605_v6, %v1864_v5  ;;  %v2603_v9 = vld [vmem:[%s4171_s1 + $0xec] sm:$0xf]  ;;  %v1866_v10 = vld [vmem:[%s4171_s1 + $0xf8] sm:$0xf0]  ;;  %v1840_v11 = vld [vmem:[%s4171_s1 + $0xc0] sm:$0xf] }
   0x4   :  { %230 = vmatpush.bf16.msra.mxu0 %v1857_v3  ;;  %v1869_v12 = vor.u32 %v2603_v9, %v1866_v10  ;;  %v2600_v13 = vld [vmem:[%s4171_s1 + $0xcc] sm:$0xf0]  ;;  %v2598_v14 = vld [vmem:[%s4171_s1 + $0xc4] sm:$0xf]  ;;  %v1842_v15 = vld [vmem:[%s4171_s1 + $0xd0] sm:$0xf0] }
   0x5   :  { %243 = vmatpush.bf16.msra.mxu1 %v1861_v7  ;;  %256 = vmatpush.bf16.msra.mxu2 %v1865_v8  ;;  %v1841_v16 = vor.u32 %v2600_v13, %v1840_v11  ;;  %v1845_v17 = vor.u32 %v2598_v14, %v1842_v15  ;;  %v1848_v18 = vld [vmem:[%s4171_s1 + $0xc8] sm:$0xf]  ;;  %v2601_v19 = vld [vmem:[%s4171_s1 + $0xd4] sm:$0xf0]  ;;  %v2599_v20 = vld [vmem:[%s4171_s1 + $0xcc] sm:$0xf] }
   0x6   :  { %269 = vmatpush.bf16.msra.mxu3 %v1869_v12  ;;  %v1849_v21 = vor.u32 %v2601_v19, %v1848_v18  ;;  %v1850_v22 = vld [vmem:[%s4171_s1 + $0xd8] sm:$0xf0]  ;;  %v1824_v23 = vld [vmem:[%s4171_s1 + $0xa0] sm:$0xf]  ;;  %v2596_v24 = vld [vmem:[%s4171_s1 + $0xac] sm:$0xf0] }
   0x7   :  { %v1853_v25 = vor.u32 %v2599_v20, %v1850_v22  ;;  %v2594_v26 = vld [vmem:[%s4171_s1 + $0xa4] sm:$0xf]  ;;  %v1826_v27 = vld [vmem:[%s4171_s1 + $0xb0] sm:$0xf0]  ;;  %v1832_v28 = vld [vmem:[%s4171_s1 + $0xa8] sm:$0xf]  ;;  %v1825_v29 = vor.u32 %v2596_v24, %v1824_v23 }
   0x8   :  { %231 = vmatpush.bf16.msra.mxu0 %v1841_v16  ;;  %v2597_v30 = vld [vmem:[%s4171_s1 + $0xb4] sm:$0xf0]  ;;  %v2595_v31 = vld [vmem:[%s4171_s1 + $0xac] sm:$0xf]  ;;  %v1834_v32 = vld [vmem:[%s4171_s1 + $0xb8] sm:$0xf0]  ;;  %v1829_v33 = vor.u32 %v2594_v26, %v1826_v27 }
   0x9   :  { %244 = vmatpush.bf16.msra.mxu1 %v1845_v17  ;;  %257 = vmatpush.bf16.msra.mxu2 %v1849_v21  ;;  %v1833_v34 = vor.u32 %v2597_v30, %v1832_v28  ;;  %v1808_v35 = vld [vmem:[%s4171_s1 + $0x80] sm:$0xf]  ;;  %v2592_v36 = vld [vmem:[%s4171_s1 + $0x8c] sm:$0xf0]  ;;  %v2590_v37 = vld [vmem:[%s4171_s1 + $0x84] sm:$0xf]  ;;  %v1837_v38 = vor.u32 %v2595_v31, %v1834_v32 }
   0xa   :  { %270 = vmatpush.bf16.msra.mxu3 %v1853_v25  ;;  %v1810_v39 = vld [vmem:[%s4171_s1 + $0x90] sm:$0xf0]  ;;  %v1816_v40 = vld [vmem:[%s4171_s1 + $0x88] sm:$0xf]  ;;  %v2593_v41 = vld [vmem:[%s4171_s1 + $0x94] sm:$0xf0]  ;;  %v1809_v44 = vor.u32 %v2592_v36, %v1808_v35 }
   0xb   :  { %v2591_v42 = vld [vmem:[%s4171_s1 + $0x8c] sm:$0xf]  ;;  %v1818_v43 = vld [vmem:[%s4171_s1 + $0x98] sm:$0xf0]  ;;  %v1813_v45 = vor.u32 %v2590_v37, %v1810_v39  ;;  %v1817_v46 = vor.u32 %v2593_v41, %v1816_v40  ;;  %v1792_v47 = vld [vmem:[%s4171_s1 + $0x60] sm:$0xf] }
   0xc   :  { %232 = vmatpush.bf16.msra.mxu0 %v1825_v29  ;;  %v2588_v48 = vld [vmem:[%s4171_s1 + $0x6c] sm:$0xf0]  ;;  %v2586_v49 = vld [vmem:[%s4171_s1 + $0x64] sm:$0xf]  ;;  %v1821_v50 = vor.u32 %v2591_v42, %v1818_v43  ;;  %v1794_v51 = vld [vmem:[%s4171_s1 + $0x70] sm:$0xf0] }
   0xd   :  { %245 = vmatpush.bf16.msra.mxu1 %v1829_v33  ;;  %258 = vmatpush.bf16.msra.mxu2 %v1833_v34  ;;  %v1800_v52 = vld [vmem:[%s4171_s1 + $0x68] sm:$0xf]  ;;  %v2589_v53 = vld [vmem:[%s4171_s1 + $0x74] sm:$0xf0]  ;;  %v2587_v54 = vld [vmem:[%s4171_s1 + $0x6c] sm:$0xf]  ;;  %v1793_v56 = vor.u32 %v2588_v48, %v1792_v47  ;;  %v1797_v57 = vor.u32 %v2586_v49, %v1794_v51 }
   0xe   :  { %271 = vmatpush.bf16.msra.mxu3 %v1837_v38  ;;  %v1802_v55 = vld [vmem:[%s4171_s1 + $0x78] sm:$0xf0]  ;;  %v1801_v58 = vor.u32 %v2589_v53, %v1800_v52  ;;  %v1776_v59 = vld [vmem:[%s4171_s1 + $0x40] sm:$0xf]  ;;  %v2584_v60 = vld [vmem:[%s4171_s1 + $0x4c] sm:$0xf0] }
   0xf   :  { %v2582_v61 = vld [vmem:[%s4171_s1 + $0x44] sm:$0xf]  ;;  %v1805_v62 = vor.u32 %v2587_v54, %v1802_v55  ;;  %v1778_v63 = vld [vmem:[%s4171_s1 + $0x50] sm:$0xf0]  ;;  %v1784_v0 = vld [vmem:[%s4171_s1 + $0x48] sm:$0xf]  ;;  %v1777_v4 = vor.u32 %v2584_v60, %v1776_v59 }
  0x10   :  { %233 = vmatpush.bf16.msra.mxu0 %v1809_v44  ;;  %v2585_v1 = vld [vmem:[%s4171_s1 + $0x54] sm:$0xf0]  ;;  %v2583_v2 = vld [vmem:[%s4171_s1 + $0x4c] sm:$0xf]  ;;  %v1786_v3 = vld [vmem:[%s4171_s1 + $0x58] sm:$0xf0]  ;;  %v1781_v5 = vor.u32 %v2582_v61, %v1778_v63 }
  0x11   :  { %246 = vmatpush.bf16.msra.mxu1 %v1813_v45  ;;  %259 = vmatpush.bf16.msra.mxu2 %v1817_v46  ;;  %v1785_v6 = vor.u32 %v2585_v1, %v1784_v0  ;;  %v1760_v7 = vld [vmem:[%s4171_s1 + $0x20] sm:$0xf]  ;;  %v2580_v8 = vld [vmem:[%s4171_s1 + $0x2c] sm:$0xf0]  ;;  %v2578_v9 = vld [vmem:[%s4171_s1 + $0x24] sm:$0xf]  ;;  %v1789_v10 = vor.u32 %v2583_v2, %v1786_v3 }
  0x12   :  { %272 = vmatpush.bf16.msra.mxu3 %v1821_v50  ;;  %v1762_v11 = vld [vmem:[%s4171_s1 + $0x30] sm:$0xf0]  ;;  %v1768_v12 = vld [vmem:[%s4171_s1 + $0x28] sm:$0xf]  ;;  %v2581_v13 = vld [vmem:[%s4171_s1 + $0x34] sm:$0xf0]  ;;  %v1761_v16 = vor.u32 %v2580_v8, %v1760_v7 }
  0x13   :  { %v2579_v14 = vld [vmem:[%s4171_s1 + $0x2c] sm:$0xf]  ;;  %v1770_v15 = vld [vmem:[%s4171_s1 + $0x38] sm:$0xf0]  ;;  %v1744_v17 = vld [vmem:[%s4171_s1] sm:$0xf]  ;;  %v1765_v18 = vor.u32 %v2578_v9, %v1762_v11  ;;  %v1769_v19 = vor.u32 %v2581_v13, %v1768_v12 }
  0x14   :  { %234 = vmatpush.bf16.msra.mxu0 %v1793_v56  ;;  %v2576_v20 = vld [vmem:[%s4171_s1 + $0xc] sm:$0xf0]  ;;  %v2574_v21 = vld [vmem:[%s4171_s1 + $0x4] sm:$0xf]  ;;  %v1746_v22 = vld [vmem:[%s4171_s1 + $0x10] sm:$0xf0]  ;;  %v1773_v23 = vor.u32 %v2579_v14, %v1770_v15 }
  0x15   :  { %247 = vmatpush.bf16.msra.mxu1 %v1797_v57  ;;  %260 = vmatpush.bf16.msra.mxu2 %v1801_v58  ;;  %v1752_v24 = vld [vmem:[%s4171_s1 + $0x8] sm:$0xf]  ;;  %v2577_v25 = vld [vmem:[%s4171_s1 + $0x14] sm:$0xf0]  ;;  %v2575_v26 = vld [vmem:[%s4171_s1 + $0xc] sm:$0xf]  ;;  %v1745_v30 = vor.u32 %v2576_v20, %v1744_v17  ;;  %v1749_v33 = vor.u32 %v2574_v21, %v1746_v22 }
  0x16   :  { %273 = vmatpush.bf16.msra.mxu3 %v1805_v62  ;;  %v1754_v27 = vld [vmem:[%s4171_s1 + $0x18] sm:$0xf0]  ;;  %v1928_v28 = vld [vmem:[%s4173_s3 + $0x70] sm:$0xf]  ;;  %v2621_v29 = vld [vmem:[%s4173_s3 + $0x74] sm:$0xf0]  ;;  %v1753_v34 = vor.u32 %v2577_v25, %v1752_v24 }
  0x17   :  { %v1992_v31 = vld [vmem:[%s4173_s3 + $0xf0] sm:$0xf]  ;;  %v2637_v32 = vld [vmem:[%s4173_s3 + $0xf4] sm:$0xf0]  ;;  %v1757_v35 = vor.u32 %v2575_v26, %v1754_v27  ;;  %v1929_v36 = vor.u32 %v2621_v29, %v1928_v28  ;;  %v1920_v37 = vld [vmem:[%s4173_s3 + $0x60] sm:$0xf] }
  0x18   :  { %235 = vmatpush.bf16.msra.mxu0 %v1777_v4  ;;  %v2056_v38 = vld [vmem:[%s4173_s3 + $0x170] sm:$0xf]  ;;  %v2653_v39 = vld [vmem:[%s4173_s3 + $0x174] sm:$0xf0]  ;;  %v1993_v40 = vor.u32 %v2637_v32, %v1992_v31  ;;  %v2619_v41 = vld [vmem:[%s4173_s3 + $0x64] sm:$0xf0] }
  0x19   :  { %248 = vmatpush.bf16.msra.mxu1 %v1781_v5  ;;  %261 = vmatpush.bf16.msra.mxu2 %v1785_v6  ;;  %v2120_v42 = vld [vmem:[%s4173_s3 + $0x1f0] sm:$0xf]  ;;  %v2669_v43 = vld [vmem:[%s4173_s3 + $0x1f4] sm:$0xf0]  ;;  %v27_v44 = vld [vmem:[%s4170_s0] sm:$0xf]  ;;  %v2057_v47 = vor.u32 %v2653_v39, %v2056_v38  ;;  %v1921_v48 = vor.u32 %v2619_v41, %v1920_v37 }
  0x1a   :  { %274 = vmatpush.bf16.msra.mxu3 %v1789_v10  ;;  %v1984_v45 = vld [vmem:[%s4173_s3 + $0xe0] sm:$0xf]  ;;  %v2635_v46 = vld [vmem:[%s4173_s3 + $0xe4] sm:$0xf0]  ;;  %v2121_v49 = vor.u32 %v2669_v43, %v2120_v42  ;;  %v1912_v50 = vld [vmem:[%s4173_s3 + $0x50] sm:$0xf] }
  0x1b   :  { %v2048_v51 = vld [vmem:[%s4173_s3 + $0x160] sm:$0xf]  ;;  %v2651_v52 = vld [vmem:[%s4173_s3 + $0x164] sm:$0xf0]  ;;  %v1985_v53 = vor.u32 %v2635_v46, %v1984_v45  ;;  %v2617_v54 = vld [vmem:[%s4173_s3 + $0x54] sm:$0xf0] }
  0x1c   :  { %236 = vmatpush.bf16.msra.mxu0 %v1761_v16  ;;  %v2112_v55 = vld [vmem:[%s4173_s3 + $0x1e0] sm:$0xf]  ;;  %v2667_v56 = vld [vmem:[%s4173_s3 + $0x1e4] sm:$0xf0]  ;;  %v1976_v57 = vld [vmem:[%s4173_s3 + $0xd0] sm:$0xf]  ;;  %v2049_v59 = vor.u32 %v2651_v52, %v2048_v51  ;;  %v1913_v60 = vor.u32 %v2617_v54, %v1912_v50 }
  0x1d   :  { %249 = vmatpush.bf16.msra.mxu1 %v1765_v18  ;;  %262 = vmatpush.bf16.msra.mxu2 %v1769_v19  ;;  %v2633_v58 = vld [vmem:[%s4173_s3 + $0xd4] sm:$0xf0]  ;;  %v2113_v61 = vor.u32 %v2667_v56, %v2112_v55  ;;  %v1904_v62 = vld [vmem:[%s4173_s3 + $0x40] sm:$0xf]  ;;  %v2040_v63 = vld [vmem:[%s4173_s3 + $0x150] sm:$0xf] }
  0x1e   :  { %275 = vmatpush.bf16.msra.mxu3 %v1773_v23  ;;  %v2649_v0 = vld [vmem:[%s4173_s3 + $0x154] sm:$0xf0]  ;;  %v1977_v1 = vor.u32 %v2633_v58, %v1976_v57  ;;  %v2615_v2 = vld [vmem:[%s4173_s3 + $0x44] sm:$0xf0]  ;;  %v2104_v3 = vld [vmem:[%s4173_s3 + $0x1d0] sm:$0xf] }
  0x1f   :  { %v2665_v4 = vld [vmem:[%s4173_s3 + $0x1d4] sm:$0xf0]  ;;  %v1968_v5 = vld [vmem:[%s4173_s3 + $0xc0] sm:$0xf]  ;;  %v2631_v6 = vld [vmem:[%s4173_s3 + $0xc4] sm:$0xf0]  ;;  %v2041_v7 = vor.u32 %v2649_v0, %v2040_v63  ;;  %v1905_v8 = vor.u32 %v2615_v2, %v1904_v62 }
  0x20   :  { %237 = vmatpush.bf16.msra.mxu0 %v1745_v30  ;;  %v2105_v9 = vor.u32 %v2665_v4, %v2104_v3  ;;  %v1896_v10 = vld [vmem:[%s4173_s3 + $0x30] sm:$0xf]  ;;  %v2032_v11 = vld [vmem:[%s4173_s3 + $0x140] sm:$0xf]  ;;  %v2647_v12 = vld [vmem:[%s4173_s3 + $0x144] sm:$0xf0]  ;;  %v1969_v13 = vor.u32 %v2631_v6, %v1968_v5 }
  0x21   :  { %250 = vmatpush.bf16.msra.mxu1 %v1749_v33  ;;  %263 = vmatpush.bf16.msra.mxu2 %v1753_v34  ;;  %v2613_v14 = vld [vmem:[%s4173_s3 + $0x34] sm:$0xf0]  ;;  %v2096_v15 = vld [vmem:[%s4173_s3 + $0x1c0] sm:$0xf]  ;;  %v2663_v16 = vld [vmem:[%s4173_s3 + $0x1c4] sm:$0xf0]  ;;  %v2033_v19 = vor.u32 %v2647_v12, %v2032_v11 }
  0x22   :  { %276 = vmatpush.bf16.msra.mxu3 %v1757_v35  ;;  %v1960_v17 = vld [vmem:[%s4173_s3 + $0xb0] sm:$0xf]  ;;  %v2629_v18 = vld [vmem:[%s4173_s3 + $0xb4] sm:$0xf0]  ;;  %v1897_v20 = vor.u32 %v2613_v14, %v1896_v10  ;;  %v2097_v21 = vor.u32 %v2663_v16, %v2096_v15  ;;  %v1888_v22 = vld [vmem:[%s4173_s3 + $0x20] sm:$0xf] }
  0x23   :  { %238 = vmatmul.bf16.vlgmr.msra.gmra.mxu0 %v27_v44  ;;  %v2024_v23 = vld [vmem:[%s4173_s3 + $0x130] sm:$0xf]  ;;  %v2645_v24 = vld [vmem:[%s4173_s3 + $0x134] sm:$0xf0]  ;;  %v1961_v25 = vor.u32 %v2629_v18, %v1960_v17  ;;  %v2611_v26 = vld [vmem:[%s4173_s3 + $0x24] sm:$0xf0] }
  0x24   :  { %680 = vmatpush.bf16.msrb.mxu0 %v1929_v36  ;;  %251 = vmatmul.bf16.vlgmr.msra.gmra.mxu1 %v27_v44  ;;  %v2088_v27 = vld [vmem:[%s4173_s3 + $0x1b0] sm:$0xf]  ;;  %v2661_v28 = vld [vmem:[%s4173_s3 + $0x1b4] sm:$0xf0]  ;;  %v1952_v29 = vld [vmem:[%s4173_s3 + $0xa0] sm:$0xf] }
  0x25   :  { %693 = vmatpush.bf16.msrb.mxu1 %v1993_v40  ;;  %264 = vmatmul.bf16.vlgmr.msra.gmra.mxu2 %v27_v44  ;;  %v2627_v30 = vld [vmem:[%s4173_s3 + $0xa4] sm:$0xf0] }
  0x26   :  { %277 = vmatmul.bf16.vlgmr.msra.gmra.mxu3 %v27_v44  ;;  %706 = vmatpush.bf16.msrb.mxu2 %v2057_v47 }
  0x27   :  { %719 = vmatpush.bf16.msrb.mxu3 %v2121_v49 }
  0x28   :  { %681 = vmatpush.bf16.msrb.mxu0 %v1921_v48 }
  0x29   :  { %694 = vmatpush.bf16.msrb.mxu1 %v1985_v53 }
  0x2a   :  { %707 = vmatpush.bf16.msrb.mxu2 %v2049_v59 }
  0x2b   :  { %720 = vmatpush.bf16.msrb.mxu3 %v2113_v61 }
  0x2c   :  { %682 = vmatpush.bf16.msrb.mxu0 %v1913_v60 }
  0x2d   :  { %695 = vmatpush.bf16.msrb.mxu1 %v1977_v1 }
  0x2e   :  { %708 = vmatpush.bf16.msrb.mxu2 %v2041_v7 }
  0x2f   :  { %721 = vmatpush.bf16.msrb.mxu3 %v2105_v9 }
  0x30   :  { %683 = vmatpush.bf16.msrb.mxu0 %v1905_v8 }
  0x31   :  { %696 = vmatpush.bf16.msrb.mxu1 %v1969_v13 }
  0x32   :  { %12 = vsyncpa [#allocation3], 0  ;;  %709 = vmatpush.bf16.msrb.mxu2 %v2033_v19  ;;  %v2025_v31 = vor.u32 %v2645_v24, %v2024_v23  ;;  %v1889_v32 = vor.u32 %v2611_v26, %v1888_v22  ;;  %v2089_v33 = vor.u32 %v2661_v28, %v2088_v27  ;;  %v1880_v34 = vld [vmem:[%s4173_s3 + $0x10] sm:$0xf]  ;;  %v2016_v35 = vld [vmem:[%s4173_s3 + $0x120] sm:$0xf]  ;;  %v1953_v37 = vor.u32 %v2627_v30, %v1952_v29 }
  0x33   :  { %722 = vmatpush.bf16.msrb.mxu3 %v2097_v21  ;;  %v2643_v36 = vld [vmem:[%s4173_s3 + $0x124] sm:$0xf0]  ;;  %v2609_v38 = vld [vmem:[%s4173_s3 + $0x14] sm:$0xf0]  ;;  %v2080_v39 = vld [vmem:[%s4173_s3 + $0x1a0] sm:$0xf] }
  0x34   :  { %684 = vmatpush.bf16.msrb.mxu0 %v1897_v20  ;;  %v2659_v40 = vld [vmem:[%s4173_s3 + $0x1a4] sm:$0xf0]  ;;  %v1944_v41 = vld [vmem:[%s4173_s3 + $0x90] sm:$0xf]  ;;  %v2625_v42 = vld [vmem:[%s4173_s3 + $0x94] sm:$0xf0]  ;;  %v2017_v43 = vor.u32 %v2643_v36, %v2016_v35  ;;  %v1881_v45 = vor.u32 %v2609_v38, %v1880_v34 }
  0x35   :  { %697 = vmatpush.bf16.msrb.mxu1 %v1961_v25  ;;  %v1872_v44 = vld [vmem:[%s4173_s3] sm:$0xf]  ;;  %v2081_v46 = vor.u32 %v2659_v40, %v2080_v39  ;;  %v2607_v47 = vld [vmem:[%s4173_s3 + $0x4] sm:$0xf0]  ;;  %v2008_v48 = vld [vmem:[%s4173_s3 + $0x110] sm:$0xf]  ;;  %v1945_v50 = vor.u32 %v2625_v42, %v1944_v41 }
  0x36   :  { %710 = vmatpush.bf16.msrb.mxu2 %v2025_v31  ;;  %v2641_v49 = vld [vmem:[%s4173_s3 + $0x114] sm:$0xf0]  ;;  %v1936_v51 = vld [vmem:[%s4173_s3 + $0x80] sm:$0xf]  ;;  %v2072_v52 = vld [vmem:[%s4173_s3 + $0x190] sm:$0xf]  ;;  %v1873_v60 = vor.u32 %v2607_v47, %v1872_v44 }
  0x37   :  { %723 = vmatpush.bf16.msrb.mxu3 %v2089_v33  ;;  %v2657_v53 = vld [vmem:[%s4173_s3 + $0x194] sm:$0xf0]  ;;  %v2623_v54 = vld [vmem:[%s4173_s3 + $0x84] sm:$0xf0]  ;;  %v2620_v55 = vld [vmem:[%s4173_s3 + $0x74] sm:$0xf]  ;;  %v2009_v59 = vor.u32 %v2641_v49, %v2008_v48 }
  0x38   :  { %685 = vmatpush.bf16.msrb.mxu0 %v1889_v32  ;;  %v1930_v56 = vld [vmem:[%s4173_s3 + $0x78] sm:$0xf0]  ;;  %v2636_v57 = vld [vmem:[%s4173_s3 + $0xf4] sm:$0xf]  ;;  %v2073_v61 = vor.u32 %v2657_v53, %v2072_v52  ;;  %v2618_v62 = vld [vmem:[%s4173_s3 + $0x64] sm:$0xf]  ;;  %v1937_v2 = vor.u32 %v2623_v54, %v1936_v51 }
  0x39   :  { %698 = vmatpush.bf16.msrb.mxu1 %v1953_v37  ;;  %v1994_v58 = vld [vmem:[%s4173_s3 + $0xf8] sm:$0xf0]  ;;  %v2000_v63 = vld [vmem:[%s4173_s3 + $0x100] sm:$0xf]  ;;  %v2639_v0 = vld [vmem:[%s4173_s3 + $0x104] sm:$0xf0]  ;;  %v1933_v3 = vor.u32 %v2620_v55, %v1930_v56 }
  0x3a   :  { %711 = vmatpush.bf16.msrb.mxu2 %v2017_v43  ;;  %v2064_v1 = vld [vmem:[%s4173_s3 + $0x180] sm:$0xf]  ;;  %v2655_v4 = vld [vmem:[%s4173_s3 + $0x184] sm:$0xf0]  ;;  %v2652_v5 = vld [vmem:[%s4173_s3 + $0x174] sm:$0xf]  ;;  %v1997_v7 = vor.u32 %v2636_v57, %v1994_v58  ;;  %v2001_v13 = vor.u32 %v2639_v0, %v2000_v63 }
  0x3b   :  { %724 = vmatpush.bf16.msrb.mxu3 %v2081_v46  ;;  %v2058_v6 = vld [vmem:[%s4173_s3 + $0x178] sm:$0xf0]  ;;  %v1922_v8 = vld [vmem:[%s4173_s3 + $0x68] sm:$0xf0]  ;;  %v2668_v9 = vld [vmem:[%s4173_s3 + $0x1f4] sm:$0xf]  ;;  %v2065_v14 = vor.u32 %v2655_v4, %v2064_v1 }
  0x3c   :  { %686 = vmatpush.bf16.msrb.mxu0 %v1881_v45  ;;  %v2122_v10 = vld [vmem:[%s4173_s3 + $0x1f8] sm:$0xf0]  ;;  %v2634_v11 = vld [vmem:[%s4173_s3 + $0xe4] sm:$0xf]  ;;  %v1986_v12 = vld [vmem:[%s4173_s3 + $0xe8] sm:$0xf0]  ;;  %v2061_v15 = vor.u32 %v2652_v5, %v2058_v6  ;;  %v1925_v16 = vor.u32 %v2618_v62, %v1922_v8 }
  0x3d   :  { %699 = vmatpush.bf16.msrb.mxu1 %v1945_v50  ;;  %v2125_v17 = vor.u32 %v2668_v9, %v2122_v10  ;;  %v1989_v18 = vor.u32 %v2634_v11, %v1986_v12  ;;  %v2616_v19 = vld [vmem:[%s4173_s3 + $0x54] sm:$0xf]  ;;  %v1914_v20 = vld [vmem:[%s4173_s3 + $0x58] sm:$0xf0]  ;;  %v2650_v25 = vld [vmem:[%s4173_s3 + $0x164] sm:$0xf] }
  0x3e   :  { %712 = vmatpush.bf16.msrb.mxu2 %v2009_v59  ;;  %v2632_v21 = vld [vmem:[%s4173_s3 + $0xd4] sm:$0xf]  ;;  %v1917_v22 = vor.u32 %v2616_v19, %v1914_v20  ;;  %v1978_v23 = vld [vmem:[%s4173_s3 + $0xd8] sm:$0xf0]  ;;  %v2050_v26 = vld [vmem:[%s4173_s3 + $0x168] sm:$0xf0] }
  0x3f   :  { %725 = vmatpush.bf16.msrb.mxu3 %v2073_v61  ;;  %v1981_v24 = vor.u32 %v2632_v21, %v1978_v23  ;;  %v2053_v27 = vor.u32 %v2650_v25, %v2050_v26  ;;  %v2666_v28 = vld [vmem:[%s4173_s3 + $0x1e4] sm:$0xf]  ;;  %v2114_v29 = vld [vmem:[%s4173_s3 + $0x1e8] sm:$0xf0]  ;;  %v2648_v37 = vld [vmem:[%s4173_s3 + $0x154] sm:$0xf] }
  0x40   :  { %687 = vmatpush.bf16.msrb.mxu0 %v1873_v60  ;;  %v2117_v30 = vor.u32 %v2666_v28, %v2114_v29  ;;  %v2614_v31 = vld [vmem:[%s4173_s3 + $0x44] sm:$0xf]  ;;  %v1906_v32 = vld [vmem:[%s4173_s3 + $0x48] sm:$0xf0]  ;;  %v2042_v38 = vld [vmem:[%s4173_s3 + $0x158] sm:$0xf0] }
  0x41   :  { %700 = vmatpush.bf16.msrb.mxu1 %v1937_v2  ;;  %v2630_v33 = vld [vmem:[%s4173_s3 + $0xc4] sm:$0xf]  ;;  %v1909_v34 = vor.u32 %v2614_v31, %v1906_v32  ;;  %v1970_v35 = vld [vmem:[%s4173_s3 + $0xc8] sm:$0xf0]  ;;  %v2664_v39 = vld [vmem:[%s4173_s3 + $0x1d4] sm:$0xf]  ;;  %v2045_v40 = vor.u32 %v2648_v37, %v2042_v38 }
  0x42   :  { %713 = vmatpush.bf16.msrb.mxu2 %v2001_v13  ;;  %v1973_v36 = vor.u32 %v2630_v33, %v1970_v35  ;;  %v2106_v41 = vld [vmem:[%s4173_s3 + $0x1d8] sm:$0xf0]  ;;  %v2612_v43 = vld [vmem:[%s4173_s3 + $0x34] sm:$0xf]  ;;  %v2646_v49 = vld [vmem:[%s4173_s3 + $0x144] sm:$0xf] }
  0x43   :  { %726 = vmatpush.bf16.msrb.mxu3 %v2065_v14  ;;  %v2109_v42 = vor.u32 %v2664_v39, %v2106_v41  ;;  %v1898_v44 = vld [vmem:[%s4173_s3 + $0x38] sm:$0xf0]  ;;  %v2628_v46 = vld [vmem:[%s4173_s3 + $0xb4] sm:$0xf]  ;;  %v2034_v50 = vld [vmem:[%s4173_s3 + $0x148] sm:$0xf0] }
  0x44   :  { %732 = vmatpush.bf16.msra.mxu0 %v1933_v3  ;;  %v1901_v45 = vor.u32 %v2612_v43, %v1898_v44  ;;  %v1962_v47 = vld [vmem:[%s4173_s3 + $0xb8] sm:$0xf0]  ;;  %v2662_v51 = vld [vmem:[%s4173_s3 + $0x1c4] sm:$0xf]  ;;  %v2037_v52 = vor.u32 %v2646_v49, %v2034_v50  ;;  %v2098_v53 = vld [vmem:[%s4173_s3 + $0x1c8] sm:$0xf0] }
  0x45   :  { %745 = vmatpush.bf16.msra.mxu1 %v1997_v7  ;;  %v1965_v48 = vor.u32 %v2628_v46, %v1962_v47  ;;  %v2101_v54 = vor.u32 %v2662_v51, %v2098_v53  ;;  %v2610_v55 = vld [vmem:[%s4173_s3 + $0x24] sm:$0xf]  ;;  %v1890_v56 = vld [vmem:[%s4173_s3 + $0x28] sm:$0xf0]  ;;  %v2644_v61 = vld [vmem:[%s4173_s3 + $0x134] sm:$0xf] }
  0x46   :  { %758 = vmatpush.bf16.msra.mxu2 %v2061_v15  ;;  %v2626_v57 = vld [vmem:[%s4173_s3 + $0xa4] sm:$0xf]  ;;  %v1893_v58 = vor.u32 %v2610_v55, %v1890_v56  ;;  %v1954_v59 = vld [vmem:[%s4173_s3 + $0xa8] sm:$0xf0]  ;;  %v2026_v62 = vld [vmem:[%s4173_s3 + $0x138] sm:$0xf0] }
  0x47   :  { %771 = vmatpush.bf16.msra.mxu3 %v2125_v17  ;;  %v1957_v60 = vor.u32 %v2626_v57, %v1954_v59  ;;  %v2660_v63 = vld [vmem:[%s4173_s3 + $0x1b4] sm:$0xf]  ;;  %v2029_v0 = vor.u32 %v2644_v61, %v2026_v62  ;;  %v2090_v1 = vld [vmem:[%s4173_s3 + $0x1b8] sm:$0xf0]  ;;  %v2642_v8 = vld [vmem:[%s4173_s3 + $0x124] sm:$0xf] }
  0x48   :  { %733 = vmatpush.bf16.msra.mxu0 %v1925_v16  ;;  %v2093_v2 = vor.u32 %v2660_v63, %v2090_v1  ;;  %v2608_v3 = vld [vmem:[%s4173_s3 + $0x14] sm:$0xf]  ;;  %v1882_v4 = vld [vmem:[%s4173_s3 + $0x18] sm:$0xf0]  ;;  %v2018_v9 = vld [vmem:[%s4173_s3 + $0x128] sm:$0xf0] }
  0x49   :  { %746 = vmatpush.bf16.msra.mxu1 %v1989_v18  ;;  %v2624_v5 = vld [vmem:[%s4173_s3 + $0x94] sm:$0xf]  ;;  %v1885_v6 = vor.u32 %v2608_v3, %v1882_v4  ;;  %v1946_v7 = vld [vmem:[%s4173_s3 + $0x98] sm:$0xf0]  ;;  %v2021_v11 = vor.u32 %v2642_v8, %v2018_v9  ;;  %v2658_v12 = vld [vmem:[%s4173_s3 + $0x1a4] sm:$0xf] }
  0x4a   :  { %759 = vmatpush.bf16.msra.mxu2 %v2053_v27  ;;  %v1949_v10 = vor.u32 %v2624_v5, %v1946_v7  ;;  %v2082_v13 = vld [vmem:[%s4173_s3 + $0x1a8] sm:$0xf0]  ;;  %v2606_v14 = vld [vmem:[%s4173_s3 + $0x4] sm:$0xf]  ;;  %v2640_v21 = vld [vmem:[%s4173_s3 + $0x114] sm:$0xf] }
  0x4b   :  { %772 = vmatpush.bf16.msra.mxu3 %v2117_v30  ;;  %v2085_v15 = vor.u32 %v2658_v12, %v2082_v13  ;;  %v1874_v16 = vld [vmem:[%s4173_s3 + $0x8] sm:$0xf0]  ;;  %v2622_v17 = vld [vmem:[%s4173_s3 + $0x84] sm:$0xf]  ;;  %v2656_v23 = vld [vmem:[%s4173_s3 + $0x194] sm:$0xf] }
  0x4c   :  { %734 = vmatpush.bf16.msra.mxu0 %v1917_v22  ;;  %v1938_v18 = vld [vmem:[%s4173_s3 + $0x88] sm:$0xf0]  ;;  %v1877_v19 = vor.u32 %v2606_v14, %v1874_v16  ;;  %v2010_v22 = vld [vmem:[%s4173_s3 + $0x118] sm:$0xf0]  ;;  %v2638_v27 = vld [vmem:[%s4173_s3 + $0x104] sm:$0xf] }
  0x4d   :  { %747 = vmatpush.bf16.msra.mxu1 %v1981_v24  ;;  %v1941_v20 = vor.u32 %v2622_v17, %v1938_v18  ;;  %v2013_v24 = vor.u32 %v2640_v21, %v2010_v22  ;;  %v2074_v25 = vld [vmem:[%s4173_s3 + $0x198] sm:$0xf0]  ;;  %v2002_v28 = vld [vmem:[%s4173_s3 + $0x108] sm:$0xf0]  ;;  %v2654_v29 = vld [vmem:[%s4173_s3 + $0x184] sm:$0xf] }
  0x4e   :  { %760 = vmatpush.bf16.msra.mxu2 %v2045_v40  ;;  %v2077_v26 = vor.u32 %v2656_v23, %v2074_v25  ;;  %v2005_v30 = vor.u32 %v2638_v27, %v2002_v28  ;;  %v2066_v31 = vld [vmem:[%s4173_s3 + $0x188] sm:$0xf0]  ;;  %v60_v32 = vld [vmem:[%s4172_s2] sm:$0xf]  ;;  %v2324_v39 = vld [vmem:[%s4175_s5 + $0x188] sm:$0xf] }
  0x4f   :  { %773 = vmatpush.bf16.msra.mxu3 %v2109_v42  ;;  %v2069_v33 = vor.u32 %v2654_v29, %v2066_v31  ;;  %v63_v35 = vperm.slane %v60_v32, 1  ;;  %v2722_v40 = vld [vmem:[%s4175_s5 + $0x1a0] sm:$0xf0]  ;;  %v64_v44 = vperm.slane %v60_v32, 2  ;;  %v2715_v49 = vld [vmem:[%s4175_s5 + $0x168] sm:$0xf0] }
  0x50   :  { %735 = vmatpush.bf16.msra.mxu0 %v1909_v34  ;;  %v62_v34 = vperm.slane %v60_v32, 0  ;;  %v2325_v46 = vor.u32 %v2722_v40, %v2324_v39  ;;  %v2548_v50 = vld [vmem:[%s4175_s5 + $0x348] sm:$0xf]  ;;  %v2268_v61 = vld [vmem:[%s4175_s5 + $0x118] sm:$0xf]  ;;  %s1733_s12 = sshll.u32 %s4177_s7, 4  ;;  %s1734_s12 = int_to_ptr.hbm [resolvable:$true] %s1733_s12 }
  0x51   :  { %748 = vmatpush.bf16.msra.mxu1 %v1973_v36  ;;  %v2326_v55 = vld [vmem:[%s4175_s5 + $0x1a4] sm:$0xf0]  ;;  %v2520_v62 = vld [vmem:[%s4175_s5 + $0x310] sm:$0xf]  ;;  %v2771_v63 = vld [vmem:[%s4175_s5 + $0x328] sm:$0xf0] }
  0x52   :  { %761 = vmatpush.bf16.msra.mxu2 %v2037_v52  ;;  %v2778_v52 = vld [vmem:[%s4175_s5 + $0x360] sm:$0xf0]  ;;  %v2775_v3 = vld [vmem:[%s4175_s5 + $0x34c] sm:$0xf]  ;;  %v2550_v4 = vld [vmem:[%s4175_s5 + $0x364] sm:$0xf0]  ;;  %v2521_v5 = vor.u32 %v2771_v63, %v2520_v62 }
  0x53   :  { %774 = vmatpush.bf16.msra.mxu3 %v2101_v54  ;;  %v2719_v54 = vld [vmem:[%s4175_s5 + $0x18c] sm:$0xf]  ;;  %v2549_v56 = vor.u32 %v2778_v52, %v2548_v50  ;;  %v2712_v9 = vld [vmem:[%s4175_s5 + $0x154] sm:$0xf]  ;;  %v2298_v12 = vld [vmem:[%s4175_s5 + $0x16c] sm:$0xf0] }
  0x54   :  { %736 = vmatpush.bf16.msra.mxu0 %v1901_v45  ;;  %v65_v45 = vperm.slane %v60_v32, 3  ;;  %v2329_v8 = vor.u32 %v2719_v54, %v2326_v55  ;;  %v2240_v14 = vld [vmem:[%s4175_s5 + $0xe0] sm:$0xf]  ;;  %v2764_v16 = vld [vmem:[%s4175_s5 + $0x2f0] sm:$0xf0]  ;;  %v2301_v25 = vor.u32 %v2712_v9, %v2298_v12  ;;  %vm1724_vm0 = vcmask 130048  }
  0x55   :  { %749 = vmatpush.bf16.msra.mxu1 %v1965_v48  ;;  %v2296_v48 = vld [vmem:[%s4175_s5 + $0x150] sm:$0xf]  ;;  %v2701_v18 = vld [vmem:[%s4175_s5 + $0xf8] sm:$0xf0]  ;;  %v2464_v22 = vld [vmem:[%s4175_s5 + $0x2a0] sm:$0xf] }
  0x56   :  { %762 = vmatpush.bf16.msra.mxu2 %v2029_v0  ;;  %v2757_v23 = vld [vmem:[%s4175_s5 + $0x2b8] sm:$0xf0]  ;;  %v2270_v28 = vld [vmem:[%s4175_s5 + $0x134] sm:$0xf0]  ;;  %v2241_v29 = vor.u32 %v2701_v18, %v2240_v14  ;;  %v2212_v31 = vld [vmem:[%s4175_s5 + $0xa8] sm:$0xf] }
  0x57   :  { %775 = vmatpush.bf16.msra.mxu3 %v2093_v2  ;;  %v2708_v2 = vld [vmem:[%s4175_s5 + $0x130] sm:$0xf0]  ;;  %v2705_v27 = vld [vmem:[%s4175_s5 + $0x11c] sm:$0xf]  ;;  %v2694_v32 = vld [vmem:[%s4175_s5 + $0xc0] sm:$0xf0] }
  0x58   :  { %737 = vmatpush.bf16.msra.mxu0 %v1893_v58  ;;  %v2269_v13 = vor.u32 %v2708_v2, %v2268_v61  ;;  %v2698_v39 = vld [vmem:[%s4175_s5 + $0xe4] sm:$0xf]  ;;  %v2242_v40 = vld [vmem:[%s4175_s5 + $0xfc] sm:$0xf0]  ;;  %v2743_v50 = vld [vmem:[%s4175_s5 + $0x248] sm:$0xf0] }
  0x59   :  { %750 = vmatpush.bf16.msra.mxu1 %v1957_v60  ;;  %v2297_v60 = vor.u32 %v2715_v49, %v2296_v48  ;;  %v2466_v48 = vld [vmem:[%s4175_s5 + $0x2bc] sm:$0xf0]  ;;  %v2408_v49 = vld [vmem:[%s4175_s5 + $0x230] sm:$0xf]  ;;  %v2245_v52 = vor.u32 %v2698_v39, %v2242_v40  ;;  %v2214_v54 = vld [vmem:[%s4175_s5 + $0xc4] sm:$0xf0] }
  0x5a   :  { %763 = vmatpush.bf16.msra.mxu2 %v2021_v11  ;;  %v2684_v61 = vld [vmem:[%s4175_s5 + $0x74] sm:$0xf]  ;;  %v2186_v62 = vld [vmem:[%s4175_s5 + $0x8c] sm:$0xf0]  ;;  %v2130_v14 = vld [vmem:[%s4175_s5 + $0x1c] sm:$0xf0] }
  0x5b   :  { %776 = vmatpush.bf16.msra.mxu3 %v2085_v15  ;;  %v2553_v15 = vor.u32 %v2775_v3, %v2550_v4  ;;  %v2332_v3 = vld [vmem:[%s4175_s5 + $0x190] sm:$0xf]  ;;  %v2723_v4 = vld [vmem:[%s4175_s5 + $0x1a8] sm:$0xf0]  ;;  %v2702_v39 = vld [vmem:[%s4175_s5 + $0x100] sm:$0xf0] }
  0x5c   :  { %738 = vmatpush.bf16.msra.mxu0 %v1885_v6  ;;  %v2333_v9 = vor.u32 %v2723_v4, %v2332_v3  ;;  %v2699_v40 = vld [vmem:[%s4175_s5 + $0xec] sm:$0xf]  ;;  %v2685_v3 = vld [vmem:[%s4175_s5 + $0x7c] sm:$0xf]  ;;  %v2194_v4 = vld [vmem:[%s4175_s5 + $0x94] sm:$0xf0] }
  0x5d   :  { %751 = vmatpush.bf16.msra.mxu1 %v1949_v10  ;;  %v2492_v10 = vld [vmem:[%s4175_s5 + $0x2d8] sm:$0xf] }
  0x5e   :  { %764 = vmatpush.bf16.msra.mxu2 %v2013_v24  ;;  %v2493_v21 = vor.u32 %v2764_v16, %v2492_v10  ;;  %v2304_v10 = vld [vmem:[%s4175_s5 + $0x158] sm:$0xf]  ;;  %v2334_v16 = vld [vmem:[%s4175_s5 + $0x1ac] sm:$0xf0] }
  0x5f   :  { %777 = vmatpush.bf16.msra.mxu3 %v2077_v26 }
  0x60   :  { %739 = vmatpush.bf16.msra.mxu0 %v1877_v19  ;;  %v2768_v19 = vld [vmem:[%s4175_s5 + $0x314] sm:$0xf] }
  0x61   :  { %752 = vmatpush.bf16.msra.mxu1 %v1941_v20  ;;  %v2522_v20 = vld [vmem:[%s4175_s5 + $0x32c] sm:$0xf0] }
  0x62   :  { %765 = vmatpush.bf16.msra.mxu2 %v2005_v30  ;;  %v2525_v30 = vor.u32 %v2768_v19, %v2522_v20  ;;  %v2713_v20 = vld [vmem:[%s4175_s5 + $0x15c] sm:$0xf] }
  0x63   :  { %778 = vmatpush.bf16.msra.mxu3 %v2069_v33  ;;  %v2761_v33 = vld [vmem:[%s4175_s5 + $0x2dc] sm:$0xf] }
  0xa0   :  { %v239_v36 = vpop.f32.mrf.mxu0 }
  0xa1   :  { %v240_v37 = vadd.f32 %v239_v36, %v62_v34  ;;  %v252_v38 = vpop.f32.mrf.mxu1  ;;  %v2465_v34 = vor.u32 %v2757_v23, %v2464_v22  ;;  %v2436_v36 = vld [vmem:[%s4175_s5 + $0x268] sm:$0xf]  ;;  %v2740_v23 = vld [vmem:[%s4175_s5 + $0x234] sm:$0xf] }
  0xa2   :  { %v253_v41 = vadd.f32 %v252_v38, %v63_v35  ;;  %v2494_v35 = vld [vmem:[%s4175_s5 + $0x2f4] sm:$0xf0]  ;;  %v2273_v38 = vor.u32 %v2705_v27, %v2270_v28  ;;  %v2709_v27 = vld [vmem:[%s4175_s5 + $0x138] sm:$0xf0]  ;;  %v2706_v28 = vld [vmem:[%s4175_s5 + $0x124] sm:$0xf] }
  0xa3   :  { %v282_v42 = vmax.f32 %v240_v37, 0.0  ;;  %v2750_v37 = vld [vmem:[%s4175_s5 + $0x280] sm:$0xf0] }
  0xa4   :  { %v283_v43 = vmax.f32 %v253_v41, 0.0  ;;  %v2213_v41 = vor.u32 %v2694_v32, %v2212_v31  ;;  %v2380_v32 = vld [vmem:[%s4175_s5 + $0x1f8] sm:$0xf] }
  0xa5   :  { %v3452_v47 = vpack.c.bf16 %v282_v42, %v282_v42  ;;  %v2184_v42 = vld [vmem:[%s4175_s5 + $0x70] sm:$0xf] }
  0xa6   :  { %v3463_v51 = vpack.c.bf16 %v283_v43, %v283_v43  ;;  %v2687_v43 = vld [vmem:[%s4175_s5 + $0x88] sm:$0xf0] }
  0xa7   :  { %688 = vmatmul.bf16.vlgmr.msrb.gmra.mxu0 %v3452_v47  ;;  %v2185_v55 = vor.u32 %v2687_v43, %v2184_v42 }
  0xa8   :  { %v265_v53 = vpop.f32.mrf.mxu2  ;;  %701 = vmatmul.bf16.vlgmr.msrb.gmra.mxu1 %v3463_v51  ;;  %v241_v59 = vpop.f32.mrf.mxu0  ;;  %1508 = vmatpush.bf16.msrb.mxu0 %v2325_v46  ;;  %v2437_v46 = vor.u32 %v2750_v37, %v2436_v36  ;;  %v2382_v36 = vld [vmem:[%s4175_s5 + $0x214] sm:$0xf0]  ;;  %v2248_v37 = vld [vmem:[%s4175_s5 + $0xe8] sm:$0xf] }
  0xa9   :  { %v266_v57 = vadd.f32 %v265_v53, %v64_v44  ;;  %v278_v58 = vpop.f32.mrf.mxu3  ;;  %v254_v1 = vpop.f32.mrf.mxu1  ;;  %1521 = vmatpush.bf16.msrb.mxu1 %v2549_v56  ;;  %v2497_v44 = vor.u32 %v2761_v33, %v2494_v35  ;;  %v2691_v53 = vld [vmem:[%s4175_s5 + $0xac] sm:$0xf]  ;;  %v2156_v56 = vld [vmem:[%s4175_s5 + $0x38] sm:$0xf]  ;;  %v2438_v59 = vld [vmem:[%s4175_s5 + $0x284] sm:$0xf0]  ;;  %v2249_v42 = vor.u32 %v2702_v39, %v2248_v37 }
  0xaa   :  { %v279_v0 = vadd.f32 %v278_v58, %v65_v45  ;;  %v2754_v45 = vld [vmem:[%s4175_s5 + $0x2a4] sm:$0xf]  ;;  %v2747_v58 = vld [vmem:[%s4175_s5 + $0x26c] sm:$0xf]  ;;  %v2673_v1 = vld [vmem:[%s4175_s5 + $0x18] sm:$0xf0] }
  0xab   :  { %v284_v6 = vmax.f32 %v266_v57, 0.0  ;;  %v2409_v57 = vor.u32 %v2743_v50, %v2408_v49  ;;  %v2441_v2 = vor.u32 %v2747_v58, %v2438_v59  ;;  %v2736_v33 = vld [vmem:[%s4175_s5 + $0x210] sm:$0xf0]  ;;  %v2733_v35 = vld [vmem:[%s4175_s5 + $0x1fc] sm:$0xf] }
  0xac   :  { %v285_v7 = vmax.f32 %v279_v0, 0.0  ;;  %1509 = vmatpush.bf16.msrb.mxu0 %v2297_v60  ;;  %v2217_v60 = vor.u32 %v2691_v53, %v2214_v54  ;;  %v2128_v0 = vld [vmem:[%s4175_s5] sm:$0xf]  ;;  %v2220_v50 = vld [vmem:[%s4175_s5 + $0xb0] sm:$0xf] }
  0xad   :  { %v3500_v11 = vpack.c.bf16 %v284_v6, %v284_v6  ;;  %1522 = vmatpush.bf16.msrb.mxu1 %v2521_v5  ;;  %v2189_v5 = vor.u32 %v2684_v61, %v2186_v62  ;;  %v2677_v6 = vld [vmem:[%s4175_s5 + $0x3c] sm:$0xf]  ;;  %v2354_v49 = vld [vmem:[%s4175_s5 + $0x1dc] sm:$0xf0]  ;;  %v2695_v53 = vld [vmem:[%s4175_s5 + $0xc8] sm:$0xf0] }
  0xae   :  { %v3511_v17 = vpack.c.bf16 %v285_v7, %v285_v7  ;;  %v2158_v7 = vld [vmem:[%s4175_s5 + $0x54] sm:$0xf0]  ;;  %v2556_v54 = vld [vmem:[%s4175_s5 + $0x350] sm:$0xf]  ;;  %v2776_v58 = vld [vmem:[%s4175_s5 + $0x354] sm:$0xf] }
  0xaf   :  { %714 = vmatmul.bf16.vlgmr.msrb.gmra.mxu2 %v3500_v11  ;;  %v2161_v12 = vor.u32 %v2677_v6, %v2158_v7  ;;  %v2192_v62 = vld [vmem:[%s4175_s5 + $0x78] sm:$0xf]  ;;  %v2197_v6 = vor.u32 %v2685_v3, %v2194_v4  ;;  %v2769_v7 = vld [vmem:[%s4175_s5 + $0x31c] sm:$0xf]  ;;  %v2748_v37 = vld [vmem:[%s4175_s5 + $0x274] sm:$0xf] }
  0xb0   :  { %727 = vmatmul.bf16.vlgmr.msrb.gmra.mxu3 %v3511_v17  ;;  %v267_v24 = vpop.f32.mrf.mxu2  ;;  %1534 = vmatpush.bf16.msrb.mxu2 %v2329_v8  ;;  %v2129_v8 = vor.u32 %v2673_v1, %v2128_v0  ;;  %v2528_v0 = vld [vmem:[%s4175_s5 + $0x318] sm:$0xf] }
  0xb1   :  { %v280_v26 = vpop.f32.mrf.mxu3  ;;  %1510 = vmatpush.bf16.msrb.mxu0 %v2269_v13  ;;  %1547 = vmatpush.bf16.msrb.mxu3 %v2553_v15  ;;  %v2670_v13 = vld [vmem:[%s4175_s5 + $0x4] sm:$0xf]  ;;  %v2720_v15 = vld [vmem:[%s4175_s5 + $0x194] sm:$0xf]  ;;  %v2410_v24 = vld [vmem:[%s4175_s5 + $0x24c] sm:$0xf0] }
  0xb2   :  { %1523 = vmatpush.bf16.msrb.mxu1 %v2493_v21  ;;  %v2133_v18 = vor.u32 %v2670_v13, %v2130_v14  ;;  %v2337_v19 = vor.u32 %v2720_v15, %v2334_v16  ;;  %v2306_v21 = vld [vmem:[%s4175_s5 + $0x174] sm:$0xf0]  ;;  %v2413_v26 = vor.u32 %v2740_v23, %v2410_v24  ;;  %v2765_v14 = vld [vmem:[%s4175_s5 + $0x2f8] sm:$0xf0]  ;;  %v2678_v15 = vld [vmem:[%s4175_s5 + $0x44] sm:$0xf] }
  0xb3   :  { %v2309_v22 = vor.u32 %v2713_v20, %v2306_v21  ;;  %v2166_v16 = vld [vmem:[%s4175_s5 + $0x5c] sm:$0xf0]  ;;  %v2674_v23 = vld [vmem:[%s4175_s5 + $0x20] sm:$0xf0]  ;;  %v2472_v24 = vld [vmem:[%s4175_s5 + $0x2a8] sm:$0xf] }
  0xb4   :  { %1535 = vmatpush.bf16.msrb.mxu2 %v2301_v25  ;;  %v2276_v25 = vld [vmem:[%s4175_s5 + $0x120] sm:$0xf] }
  0xb5   :  { %1511 = vmatpush.bf16.msrb.mxu0 %v2241_v29  ;;  %1548 = vmatpush.bf16.msrb.mxu3 %v2525_v30  ;;  %v2278_v29 = vld [vmem:[%s4175_s5 + $0x13c] sm:$0xf0]  ;;  %v2277_v30 = vor.u32 %v2709_v27, %v2276_v25  ;;  %v2671_v27 = vld [vmem:[%s4175_s5 + $0xc] sm:$0xf] }
  0xb6   :  { %1524 = vmatpush.bf16.msrb.mxu1 %v2465_v34  ;;  %v2281_v31 = vor.u32 %v2706_v28, %v2278_v29  ;;  %v2381_v34 = vor.u32 %v2736_v33, %v2380_v32  ;;  %v2502_v20 = vld [vmem:[%s4175_s5 + $0x2fc] sm:$0xf0]  ;;  %v2138_v28 = vld [vmem:[%s4175_s5 + $0x24] sm:$0xf0] }
  0xb7   :  { %740 = vmatmul.bf16.vlgmr.msra.gmra.mxu0 %v3452_v47  ;;  %v2680_v47 = vld [vmem:[%s4175_s5 + $0x50] sm:$0xf0]  ;;  %v2474_v32 = vld [vmem:[%s4175_s5 + $0x2c4] sm:$0xf0] }
  0xb8   :  { %1536 = vmatpush.bf16.msrb.mxu2 %v2273_v38  ;;  %753 = vmatmul.bf16.vlgmr.msra.gmra.mxu1 %v3463_v51  ;;  %v2469_v51 = vor.u32 %v2754_v45, %v2466_v48  ;;  %v2157_v63 = vor.u32 %v2680_v47, %v2156_v56  ;;  %v2385_v38 = vor.u32 %v2733_v35, %v2382_v36  ;;  %v2729_v45 = vld [vmem:[%s4175_s5 + $0x1d8] sm:$0xf0]  ;;  %v2726_v48 = vld [vmem:[%s4175_s5 + $0x1c4] sm:$0xf]  ;;  %v2751_v35 = vld [vmem:[%s4175_s5 + $0x288] sm:$0xf0] }
  0xb9   :  { %1512 = vmatpush.bf16.msrb.mxu0 %v2213_v41  ;;  %1549 = vmatpush.bf16.msrb.mxu3 %v2497_v44  ;;  %v2250_v41 = vld [vmem:[%s4175_s5 + $0x104] sm:$0xf0]  ;;  %v2352_v44 = vld [vmem:[%s4175_s5 + $0x1c0] sm:$0xf]  ;;  %v2221_v56 = vor.u32 %v2695_v53, %v2220_v50  ;;  %v2734_v53 = vld [vmem:[%s4175_s5 + $0x204] sm:$0xf] }
  0xba   :  { %1525 = vmatpush.bf16.msrb.mxu1 %v2437_v46  ;;  %v2253_v43 = vor.u32 %v2699_v40, %v2250_v41  ;;  %v2353_v46 = vor.u32 %v2729_v45, %v2352_v44  ;;  %v2416_v40 = vld [vmem:[%s4175_s5 + $0x238] sm:$0xf]  ;;  %v2744_v41 = vld [vmem:[%s4175_s5 + $0x250] sm:$0xf0] }
  0xbb   :  { %v2418_v44 = vld [vmem:[%s4175_s5 + $0x254] sm:$0xf0] }
  0xbc   :  { %1537 = vmatpush.bf16.msrb.mxu2 %v2245_v52  ;;  %v2357_v52 = vor.u32 %v2726_v48, %v2354_v49  ;;  %v2388_v48 = vld [vmem:[%s4175_s5 + $0x200] sm:$0xf]  ;;  %v2737_v49 = vld [vmem:[%s4175_s5 + $0x218] sm:$0xf0] }
  0xbd   :  { %1513 = vmatpush.bf16.msrb.mxu0 %v2185_v55  ;;  %1550 = vmatpush.bf16.msrb.mxu3 %v2469_v51  ;;  %v2779_v55 = vld [vmem:[%s4175_s5 + $0x368] sm:$0xf0]  ;;  %v2692_v51 = vld [vmem:[%s4175_s5 + $0xb4] sm:$0xf] }
  0xbe   :  { %1526 = vmatpush.bf16.msrb.mxu1 %v2409_v57  ;;  %v2557_v47 = vor.u32 %v2779_v55, %v2556_v54  ;;  %v2222_v57 = vld [vmem:[%s4175_s5 + $0xcc] sm:$0xf0]  ;;  %v2390_v54 = vld [vmem:[%s4175_s5 + $0x21c] sm:$0xf0] }
  0xbf   :  { %766 = vmatmul.bf16.vlgmr.msra.gmra.mxu2 %v3500_v11  ;;  %v2716_v11 = vld [vmem:[%s4175_s5 + $0x170] sm:$0xf0]  ;;  %v2225_v59 = vor.u32 %v2692_v51, %v2222_v57  ;;  %v2360_v51 = vld [vmem:[%s4175_s5 + $0x1c8] sm:$0xf]  ;;  %v2730_v57 = vld [vmem:[%s4175_s5 + $0x1e0] sm:$0xf0] }
  0xc0   :  { %779 = vmatmul.bf16.vlgmr.msra.gmra.mxu3 %v3511_v17  ;;  %1538 = vmatpush.bf16.msrb.mxu2 %v2217_v60  ;;  %v2305_v17 = vor.u32 %v2716_v11, %v2304_v10  ;;  %v2558_v60 = vld [vmem:[%s4175_s5 + $0x36c] sm:$0xf0]  ;;  %v2164_v10 = vld [vmem:[%s4175_s5 + $0x40] sm:$0xf]  ;;  %v2681_v11 = vld [vmem:[%s4175_s5 + $0x58] sm:$0xf0] }
  0xc1   :  { %1514 = vmatpush.bf16.msrb.mxu0 %v2157_v63  ;;  %1551 = vmatpush.bf16.msrb.mxu3 %v2441_v2  ;;  %v2561_v61 = vor.u32 %v2776_v58, %v2558_v60  ;;  %v2688_v63 = vld [vmem:[%s4175_s5 + $0x90] sm:$0xf0]  ;;  %v2165_v13 = vor.u32 %v2681_v11, %v2164_v10  ;;  %v2361_v58 = vor.u32 %v2730_v57, %v2360_v51  ;;  %v2362_v60 = vld [vmem:[%s4175_s5 + $0x1e4] sm:$0xf0]  ;;  %v2342_v10 = vld [vmem:[%s4175_s5 + $0x1b4] sm:$0xf0] }
  0xc2   :  { %1527 = vmatpush.bf16.msrb.mxu1 %v2381_v34  ;;  %v2193_v1 = vor.u32 %v2688_v63, %v2192_v62  ;;  %v2772_v2 = vld [vmem:[%s4175_s5 + $0x330] sm:$0xf0]  ;;  %v2444_v34 = vld [vmem:[%s4175_s5 + $0x270] sm:$0xf]  ;;  %v2200_v57 = vld [vmem:[%s4175_s5 + $0x80] sm:$0xf] }
  0xc3   :  { %v2445_v36 = vor.u32 %v2751_v35, %v2444_v34  ;;  %v2256_v34 = vld [vmem:[%s4175_s5 + $0xf0] sm:$0xf] }
  0xc4   :  { %1539 = vmatpush.bf16.msrb.mxu2 %v2189_v5  ;;  %v2529_v5 = vor.u32 %v2772_v2, %v2528_v0 }
  0xc5   :  { %1515 = vmatpush.bf16.msrb.mxu0 %v2129_v8  ;;  %1552 = vmatpush.bf16.msrb.mxu3 %v2413_v26  ;;  %v2530_v8 = vld [vmem:[%s4175_s5 + $0x334] sm:$0xf0]  ;;  %v2758_v26 = vld [vmem:[%s4175_s5 + $0x2c0] sm:$0xf0] }
  0xc6   :  { %1528 = vmatpush.bf16.msrb.mxu1 %v2353_v46  ;;  %v2473_v29 = vor.u32 %v2758_v26, %v2472_v24  ;;  %v354_v46 = vld [vmem:[%s4174_s4] sm:$0x3] }
  0xc8   :  { %1540 = vmatpush.bf16.msrb.mxu2 %v2161_v12  ;;  %v2500_v12 = vld [vmem:[%s4175_s5 + $0x2e0] sm:$0xf] }
  0xc9   :  { %1560 = vmatpush.bf16.msra.mxu0 %v2333_v9  ;;  %1553 = vmatpush.bf16.msrb.mxu3 %v2385_v38  ;;  %v2533_v9 = vor.u32 %v2769_v7, %v2530_v8  ;;  %v2446_v38 = vld [vmem:[%s4175_s5 + $0x28c] sm:$0xf0]  ;;  %v2724_v8 = vld [vmem:[%s4175_s5 + $0x1b0] sm:$0xf0] }
  0xca   :  { %1573 = vmatpush.bf16.msra.mxu1 %v2557_v47  ;;  %v2449_v39 = vor.u32 %v2748_v37, %v2446_v38  ;;  %v356_v47 = vperm.slane %v354_v46, 0  ;;  %v2700_v37 = vld [vmem:[%s4175_s5 + $0xf4] sm:$0xf]  ;;  %v2258_v38 = vld [vmem:[%s4175_s5 + $0x10c] sm:$0xf0] }
  0xcc   :  { %1541 = vmatpush.bf16.msrb.mxu2 %v2133_v18  ;;  %v2169_v18 = vor.u32 %v2678_v15, %v2166_v16  ;;  %v2312_v16 = vld [vmem:[%s4175_s5 + $0x160] sm:$0xf] }
  0xcd   :  { %1561 = vmatpush.bf16.msra.mxu0 %v2305_v17  ;;  %1554 = vmatpush.bf16.msrb.mxu3 %v2357_v52  ;;  %v2501_v17 = vor.u32 %v2765_v14, %v2500_v12  ;;  %v2389_v52 = vor.u32 %v2737_v49, %v2388_v48  ;;  %v2564_v48 = vld [vmem:[%s4175_s5 + $0x358] sm:$0xf]  ;;  %v2780_v49 = vld [vmem:[%s4175_s5 + $0x370] sm:$0xf0] }
  0xce   :  { %1574 = vmatpush.bf16.msra.mxu1 %v2529_v5  ;;  %v2340_v5 = vld [vmem:[%s4175_s5 + $0x198] sm:$0xf]  ;;  %v2565_v51 = vor.u32 %v2780_v49, %v2564_v48  ;;  %v2742_v49 = vld [vmem:[%s4175_s5 + $0x244] sm:$0xf] }
  0xcf   :  { %v2341_v14 = vor.u32 %v2724_v8, %v2340_v5  ;;  %v2682_v8 = vld [vmem:[%s4175_s5 + $0x60] sm:$0xf0] }
  0xd0   :  { %1586 = vmatpush.bf16.msra.mxu2 %v2337_v19  ;;  %v2762_v19 = vld [vmem:[%s4175_s5 + $0x2e4] sm:$0xf] }
  0xd1   :  { %1562 = vmatpush.bf16.msra.mxu0 %v2277_v30  ;;  %1599 = vmatpush.bf16.msra.mxu3 %v2561_v61  ;;  %v2505_v21 = vor.u32 %v2762_v19, %v2502_v20  ;;  %v2141_v30 = vor.u32 %v2671_v27, %v2138_v28  ;;  %v2714_v19 = vld [vmem:[%s4175_s5 + $0x164] sm:$0xf]  ;;  %v2314_v20 = vld [vmem:[%s4175_s5 + $0x17c] sm:$0xf0] }
  0xd2   :  { %1575 = vmatpush.bf16.msra.mxu1 %v2501_v17  ;;  %v2317_v24 = vor.u32 %v2714_v19, %v2314_v20  ;;  %v2710_v28 = vld [vmem:[%s4175_s5 + $0x140] sm:$0xf0]  ;;  %v2144_v20 = vld [vmem:[%s4175_s5 + $0x10] sm:$0xf] }
  0xd4   :  { %1587 = vmatpush.bf16.msra.mxu2 %v2309_v22  ;;  %v2136_v22 = vld [vmem:[%s4175_s5 + $0x8] sm:$0xf] }
  0xd5   :  { %1563 = vmatpush.bf16.msra.mxu0 %v2249_v42  ;;  %1600 = vmatpush.bf16.msra.mxu3 %v2533_v9  ;;  %v2137_v25 = vor.u32 %v2674_v23, %v2136_v22  ;;  %v2417_v42 = vor.u32 %v2744_v41, %v2416_v40  ;;  %v2721_v9 = vld [vmem:[%s4175_s5 + $0x19c] sm:$0xf] }
  0xd6   :  { %1576 = vmatpush.bf16.msra.mxu1 %v2473_v29  ;;  %v2345_v15 = vor.u32 %v2721_v9, %v2342_v10  ;;  %v2707_v29 = vld [vmem:[%s4175_s5 + $0x12c] sm:$0xf] }
  0xd8   :  { %1588 = vmatpush.bf16.msra.mxu2 %v2281_v31  ;;  %v2755_v31 = vld [vmem:[%s4175_s5 + $0x2ac] sm:$0xf] }
  0xd9   :  { %1564 = vmatpush.bf16.msra.mxu0 %v2221_v56  ;;  %1601 = vmatpush.bf16.msra.mxu3 %v2505_v21  ;;  %v2477_v33 = vor.u32 %v2755_v31, %v2474_v32  ;;  %v2393_v56 = vor.u32 %v2734_v53, %v2390_v54  ;;  %v2777_v54 = vld [vmem:[%s4175_s5 + $0x35c] sm:$0xf] }
  0xda   :  { %1577 = vmatpush.bf16.msra.mxu1 %v2445_v36  ;;  %v2703_v36 = vld [vmem:[%s4175_s5 + $0x108] sm:$0xf0] }
  0xdc   :  { %1589 = vmatpush.bf16.msra.mxu2 %v2253_v43  ;;  %v2741_v43 = vld [vmem:[%s4175_s5 + $0x23c] sm:$0xf] }
  0xdd   :  { %1565 = vmatpush.bf16.msra.mxu0 %v2193_v1  ;;  %1602 = vmatpush.bf16.msra.mxu3 %v2477_v33  ;;  %v2421_v45 = vor.u32 %v2741_v43, %v2418_v44  ;;  %v2261_v43 = vor.u32 %v2700_v37, %v2258_v38  ;;  %v2752_v37 = vld [vmem:[%s4175_s5 + $0x290] sm:$0xf0] }
  0xde   :  { %1578 = vmatpush.bf16.msra.mxu1 %v2417_v42  ;;  %v2257_v42 = vor.u32 %v2703_v36, %v2256_v34  ;;  %v2452_v36 = vld [vmem:[%s4175_s5 + $0x278] sm:$0xf] }
  0xe0   :  { %1590 = vmatpush.bf16.msra.mxu2 %v2225_v59  ;;  %v2727_v59 = vld [vmem:[%s4175_s5 + $0x1cc] sm:$0xf] }
  0xe1   :  { %1566 = vmatpush.bf16.msra.mxu0 %v2165_v13  ;;  %1603 = vmatpush.bf16.msra.mxu3 %v2449_v39  ;;  %v2365_v61 = vor.u32 %v2727_v59, %v2362_v60  ;;  %v357_v13 = vperm.slane %v354_v46, 1  ;;  %v2696_v46 = vld [vmem:[%s4175_s5 + $0xd0] sm:$0xf0] }
  0xe2   :  { %1579 = vmatpush.bf16.msra.mxu1 %v2389_v52  ;;  %v2230_v52 = vld [vmem:[%s4175_s5 + $0xd4] sm:$0xf0] }
  0xe4   :  { %1591 = vmatpush.bf16.msra.mxu2 %v2197_v6 }
  0xe5   :  { %1567 = vmatpush.bf16.msra.mxu0 %v2137_v25  ;;  %1604 = vmatpush.bf16.msra.mxu3 %v2421_v45  ;;  %v2284_v25 = vld [vmem:[%s4175_s5 + $0x128] sm:$0xf]  ;;  %v2228_v45 = vld [vmem:[%s4175_s5 + $0xb8] sm:$0xf] }
  0xe6   :  { %1580 = vmatpush.bf16.msra.mxu1 %v2361_v58  ;;  %v2285_v32 = vor.u32 %v2710_v28, %v2284_v25  ;;  %v2689_v58 = vld [vmem:[%s4175_s5 + $0x98] sm:$0xf0]  ;;  %v2759_v25 = vld [vmem:[%s4175_s5 + $0x2c8] sm:$0xf0]  ;;  %v2756_v28 = vld [vmem:[%s4175_s5 + $0x2b4] sm:$0xf] }
  0xe7   :  { %v2201_v5 = vor.u32 %v2689_v58, %v2200_v57  ;;  %v2735_v58 = vld [vmem:[%s4175_s5 + $0x20c] sm:$0xf] }
  0xe8   :  { %1592 = vmatpush.bf16.msra.mxu2 %v2169_v18  ;;  %v2717_v18 = vld [vmem:[%s4175_s5 + $0x178] sm:$0xf0] }
  0xe9   :  { %1605 = vmatpush.bf16.msra.mxu3 %v2393_v56  ;;  %v2313_v23 = vor.u32 %v2717_v18, %v2312_v16  ;;  %v2510_v16 = vld [vmem:[%s4175_s5 + $0x304] sm:$0xf0] }
  0xec   :  { %1593 = vmatpush.bf16.msra.mxu2 %v2141_v30  ;;  %v2286_v30 = vld [vmem:[%s4175_s5 + $0x144] sm:$0xf0] }
  0xed   :  { %1606 = vmatpush.bf16.msra.mxu3 %v2365_v61  ;;  %v2289_v33 = vor.u32 %v2707_v29, %v2286_v30  ;;  %v2482_v29 = vld [vmem:[%s4175_s5 + $0x2cc] sm:$0xf0]  ;;  %v2348_v30 = vld [vmem:[%s4175_s5 + $0x1a0] sm:$0xf] }
 0x124   :  { %v689_v50 = vpop.f32.mrf.mxu0 }
 0x125   :  { %v702_v55 = vpop.f32.mrf.mxu1  ;;  %v690_v62 = vadd.f32 %v689_v50, %v356_v47  ;;  %v2693_v50 = vld [vmem:[%s4175_s5 + $0xbc] sm:$0xf]  ;;  %v2229_v47 = vor.u32 %v2696_v46, %v2228_v45  ;;  %v2424_v45 = vld [vmem:[%s4175_s5 + $0x240] sm:$0xf] }
 0x126   :  { %v2233_v60 = vor.u32 %v2693_v50, %v2230_v52  ;;  %v2745_v46 = vld [vmem:[%s4175_s5 + $0x258] sm:$0xf0]  ;;  %v2426_v50 = vld [vmem:[%s4175_s5 + $0x25c] sm:$0xf0]  ;;  %v2292_v52 = vld [vmem:[%s4175_s5 + $0x130] sm:$0xf] }
 0x127   :  { %v703_v1 = vadd.f32 %v702_v55, %v690_v62  ;;  %v2566_v55 = vld [vmem:[%s4175_s5 + $0x374] sm:$0xf0]  ;;  %v2536_v62 = vld [vmem:[%s4175_s5 + $0x320] sm:$0xf] }
 0x128   :  { %v2569_v61 = vor.u32 %v2777_v54, %v2566_v55  ;;  %v2425_v54 = vor.u32 %v2745_v46, %v2424_v45  ;;  %v2429_v55 = vor.u32 %v2742_v49, %v2426_v50  ;;  %v4158_v45 = vld [vmem:[%s4176_s6] sm:$0x7f] }
 0x12c   :  { %v691_v63 = vpop.f32.mrf.mxu0 }
 0x12d   :  { %v704_v0 = vpop.f32.mrf.mxu1  ;;  %v2773_v63 = vld [vmem:[%s4175_s5 + $0x338] sm:$0xf0] }
 0x12e   :  { %v2686_v0 = vld [vmem:[%s4175_s5 + $0x84] sm:$0xf] }
 0x132   :  { %v715_v2 = vpop.f32.mrf.mxu2 }
 0x133   :  { %v716_v3 = vadd.f32 %v715_v2, %v703_v1  ;;  %v728_v4 = vpop.f32.mrf.mxu3  ;;  %v2202_v2 = vld [vmem:[%s4175_s5 + $0x9c] sm:$0xf0] }
 0x134   :  { %v741_v7 = vpop.f32.mrf.mxu0  ;;  %v2205_v9 = vor.u32 %v2686_v0, %v2202_v2  ;;  %v2368_v0 = vld [vmem:[%s4175_s5 + $0x1d0] sm:$0xf]  ;;  %v2728_v2 = vld [vmem:[%s4175_s5 + $0x1d4] sm:$0xf] }
 0x135   :  { %v729_v6 = vadd.f32 %v728_v4, %v716_v3  ;;  %v754_v11 = vpop.f32.mrf.mxu1  ;;  %v742_v26 = vadd.f32 %v741_v7, %v357_v13  ;;  %v2770_v3 = vld [vmem:[%s4175_s5 + $0x324] sm:$0xf]  ;;  %v2538_v4 = vld [vmem:[%s4175_s5 + $0x33c] sm:$0xf0]  ;;  %v2172_v7 = vld [vmem:[%s4175_s5 + $0x48] sm:$0xf] }
 0x136   :  { %v2541_v10 = vor.u32 %v2770_v3, %v2538_v4  ;;  %v2679_v13 = vld [vmem:[%s4175_s5 + $0x4c] sm:$0xf]  ;;  %v2173_v18 = vor.u32 %v2682_v8, %v2172_v7  ;;  %v2370_v4 = vld [vmem:[%s4175_s5 + $0x1ec] sm:$0xf0]  ;;  %v2236_v7 = vld [vmem:[%s4175_s5 + $0xc0] sm:$0xf] }
 0x137   :  { %v784_v12 = vmax.f32 %v729_v6, 0.0  ;;  %v755_v35 = vadd.f32 %v754_v11, %v742_v26  ;;  %v2537_v6 = vor.u32 %v2773_v63, %v2536_v62  ;;  %v2508_v11 = vld [vmem:[%s4175_s5 + $0x2e8] sm:$0xf]  ;;  %v2672_v26 = vld [vmem:[%s4175_s5 + $0x14] sm:$0xf] }
 0x138   :  { %v2697_v8 = vld [vmem:[%s4175_s5 + $0xd8] sm:$0xf0] }
 0x139   :  { %v3864_v17 = vpack.c.bf16 %v784_v12, %v784_v12  ;;  %v2766_v12 = vld [vmem:[%s4175_s5 + $0x300] sm:$0xf0] }
 0x13a   :  { %v717_v21 = vpop.f32.mrf.mxu2  ;;  %v2509_v19 = vor.u32 %v2766_v12, %v2508_v11  ;;  %v2237_v12 = vor.u32 %v2697_v8, %v2236_v7 }
 0x13b   :  { %v730_v22 = vpop.f32.mrf.mxu3  ;;  %1516 = vmatmul.bf16.vlgmr.msrb.gmra.mxu0 %v3864_v17  ;;  %1542 = vmatmul.bf16.vlgmr.msrb.gmra.mxu2 %v3864_v17  ;;  %v2675_v21 = vld [vmem:[%s4175_s5 + $0x28] sm:$0xf0] }
 0x13c   :  { %1612 = vmatpush.bf16.msrb.mxu0 %v2341_v14  ;;  %1638 = vmatpush.bf16.msrb.mxu2 %v2345_v15  ;;  %v743_v27 = vpop.f32.mrf.mxu0  ;;  %v2174_v14 = vld [vmem:[%s4175_s5 + $0x64] sm:$0xf0]  ;;  %v2763_v15 = vld [vmem:[%s4175_s5 + $0x2ec] sm:$0xf] }
 0x13d   :  { %v756_v31 = vpop.f32.mrf.mxu1  ;;  %v2177_v22 = vor.u32 %v2679_v13, %v2174_v14  ;;  %v2146_v27 = vld [vmem:[%s4175_s5 + $0x2c] sm:$0xf0]  ;;  %v2544_v13 = vld [vmem:[%s4175_s5 + $0x328] sm:$0xf]  ;;  %v2774_v14 = vld [vmem:[%s4175_s5 + $0x340] sm:$0xf0] }
 0x13e   :  { %v2725_v31 = vld [vmem:[%s4175_s5 + $0x1b8] sm:$0xf0]  ;;  %v2149_v34 = vor.u32 %v2672_v26, %v2146_v27  ;;  %v2488_v26 = vld [vmem:[%s4175_s5 + $0x2b8] sm:$0xf]  ;;  %v2760_v27 = vld [vmem:[%s4175_s5 + $0x2d0] sm:$0xf0] }
 0x13f   :  { %v2349_v38 = vor.u32 %v2725_v31, %v2348_v30  ;;  %v2489_v30 = vor.u32 %v2760_v27, %v2488_v26 }
 0x140   :  { %1613 = vmatpush.bf16.msrb.mxu0 %v2313_v23  ;;  %1639 = vmatpush.bf16.msrb.mxu2 %v2317_v24  ;;  %v2513_v23 = vor.u32 %v2763_v15, %v2510_v16  ;;  %v2480_v24 = vld [vmem:[%s4175_s5 + $0x2b0] sm:$0xf]  ;;  %v2208_v15 = vld [vmem:[%s4175_s5 + $0x88] sm:$0xf]  ;;  %v2690_v16 = vld [vmem:[%s4175_s5 + $0xa0] sm:$0xf0] }
 0x142   :  { %v767_v39 = vpop.f32.mrf.mxu2 }
 0x143   :  { %v768_v40 = vadd.f32 %v767_v39, %v755_v35  ;;  %v780_v41 = vpop.f32.mrf.mxu3  ;;  %v2485_v35 = vor.u32 %v2756_v28, %v2482_v29  ;;  %v2749_v39 = vld [vmem:[%s4175_s5 + $0x27c] sm:$0xf]  ;;  %v2152_v28 = vld [vmem:[%s4175_s5 + $0x18] sm:$0xf]  ;;  %v2676_v29 = vld [vmem:[%s4175_s5 + $0x30] sm:$0xf0] }
 0x144   :  { %1614 = vmatpush.bf16.msrb.mxu0 %v2285_v32  ;;  %1640 = vmatpush.bf16.msrb.mxu2 %v2289_v33  ;;  %v2145_v32 = vor.u32 %v2675_v21, %v2144_v20  ;;  %v2481_v33 = vor.u32 %v2759_v25, %v2480_v24  ;;  %v2516_v20 = vld [vmem:[%s4175_s5 + $0x2f0] sm:$0xf]  ;;  %v2767_v21 = vld [vmem:[%s4175_s5 + $0x308] sm:$0xf0]  ;;  %v2153_v31 = vor.u32 %v2676_v29, %v2152_v28 }
 0x145   :  { %v781_v44 = vadd.f32 %v780_v41, %v768_v40  ;;  %v2454_v40 = vld [vmem:[%s4175_s5 + $0x294] sm:$0xf0]  ;;  %v2320_v41 = vld [vmem:[%s4175_s5 + $0x168] sm:$0xf]  ;;  %v2517_v24 = vor.u32 %v2767_v21, %v2516_v20 }
 0x147   :  { %v785_v53 = vmax.f32 %v781_v44, 0.0  ;;  %v2457_v44 = vor.u32 %v2749_v39, %v2454_v40  ;;  %v2739_v39 = vld [vmem:[%s4175_s5 + $0x228] sm:$0xf0] }
 0x148   :  { %1615 = vmatpush.bf16.msrb.mxu0 %v2257_v42  ;;  %1641 = vmatpush.bf16.msrb.mxu2 %v2261_v43  ;;  %v2718_v42 = vld [vmem:[%s4175_s5 + $0x180] sm:$0xf0]  ;;  %v2453_v43 = vor.u32 %v2752_v37, %v2452_v36 }
 0x149   :  { %v3925_v56 = vpack.c.bf16 %v785_v53, %v785_v53  ;;  %v2321_v48 = vor.u32 %v2718_v42, %v2320_v41  ;;  %v2711_v53 = vld [vmem:[%s4175_s5 + $0x148] sm:$0xf0]  ;;  %v2746_v36 = vld [vmem:[%s4175_s5 + $0x260] sm:$0xf0]  ;;  %v2376_v41 = vld [vmem:[%s4175_s5 + $0x1d8] sm:$0xf] }
 0x14a   :  { %v769_v59 = vpop.f32.mrf.mxu2  ;;  %v2293_v57 = vor.u32 %v2711_v53, %v2292_v52  ;;  %v919_v53 = vperm.slane %v4158_v45, 1 }
 0x14b   :  { %v782_v1 = vpop.f32.mrf.mxu3  ;;  %1529 = vmatmul.bf16.vlgmr.msrb.gmra.mxu1 %v3925_v56  ;;  %1555 = vmatmul.bf16.vlgmr.msrb.gmra.mxu3 %v3925_v56  ;;  %v2398_v59 = vld [vmem:[%s4175_s5 + $0x224] sm:$0xf0] }
 0x14c   :  { %1568 = vmatmul.bf16.vlgmr.msra.gmra.mxu0 %v3864_v17  ;;  %1594 = vmatmul.bf16.vlgmr.msra.gmra.mxu2 %v3864_v17  ;;  %v2401_v63 = vor.u32 %v2735_v58, %v2398_v59  ;;  %v2731_v1 = vld [vmem:[%s4175_s5 + $0x1e8] sm:$0xf0] }
 0x14d   :  { %1616 = vmatpush.bf16.msrb.mxu0 %v2229_v47  ;;  %1625 = vmatpush.bf16.msrb.mxu1 %v2565_v51  ;;  %v2396_v47 = vld [vmem:[%s4175_s5 + $0x208] sm:$0xf]  ;;  %v2738_v51 = vld [vmem:[%s4175_s5 + $0x220] sm:$0xf0] }
 0x14e   :  { %1642 = vmatpush.bf16.msrb.mxu2 %v2233_v60  ;;  %1651 = vmatpush.bf16.msrb.mxu3 %v2569_v61  ;;  %v2264_v60 = vld [vmem:[%s4175_s5 + $0xf8] sm:$0xf]  ;;  %v2704_v61 = vld [vmem:[%s4175_s5 + $0x110] sm:$0xf0]  ;;  %v2397_v62 = vor.u32 %v2738_v51, %v2396_v47 }
 0x14f   :  { %v2265_v3 = vor.u32 %v2704_v61, %v2264_v60 }
 0x151   :  { %1617 = vmatpush.bf16.msrb.mxu0 %v2201_v5  ;;  %1626 = vmatpush.bf16.msrb.mxu1 %v2537_v6  ;;  %v2572_v5 = vld [vmem:[%s4175_s5 + $0x360] sm:$0xf]  ;;  %v2781_v6 = vld [vmem:[%s4175_s5 + $0x378] sm:$0xf0] }
 0x152   :  { %1643 = vmatpush.bf16.msrb.mxu2 %v2205_v9  ;;  %1652 = vmatpush.bf16.msrb.mxu3 %v2541_v10  ;;  %v2369_v9 = vor.u32 %v2731_v1, %v2368_v0  ;;  %v2373_v10 = vor.u32 %v2728_v2, %v2370_v4  ;;  %v2573_v11 = vor.u32 %v2781_v6, %v2572_v5 }
 0x155   :  { %1618 = vmatpush.bf16.msrb.mxu0 %v2173_v18  ;;  %1627 = vmatpush.bf16.msrb.mxu1 %v2509_v19  ;;  %v2545_v18 = vor.u32 %v2774_v14, %v2544_v13  ;;  %v2209_v19 = vor.u32 %v2690_v16, %v2208_v15 }
 0x156   :  { %1644 = vmatpush.bf16.msrb.mxu2 %v2177_v22  ;;  %1653 = vmatpush.bf16.msrb.mxu3 %v2513_v23  ;;  %v2180_v22 = vld [vmem:[%s4175_s5 + $0x50] sm:$0xf]  ;;  %v2683_v23 = vld [vmem:[%s4175_s5 + $0x68] sm:$0xf0] }
 0x157   :  { %v2181_v25 = vor.u32 %v2683_v23, %v2180_v22  ;;  %v922_v23 = vperm.slane %v4158_v45, 4 }
 0x159   :  { %1619 = vmatpush.bf16.msrb.mxu0 %v2145_v32  ;;  %1628 = vmatpush.bf16.msrb.mxu1 %v2481_v33  ;;  %v2460_v32 = vld [vmem:[%s4175_s5 + $0x280] sm:$0xf]  ;;  %v2753_v33 = vld [vmem:[%s4175_s5 + $0x298] sm:$0xf0] }
 0x15a   :  { %1645 = vmatpush.bf16.msrb.mxu2 %v2149_v34  ;;  %1654 = vmatpush.bf16.msrb.mxu3 %v2485_v35  ;;  %v2461_v34 = vor.u32 %v2753_v33, %v2460_v32  ;;  %v2432_v35 = vld [vmem:[%s4175_s5 + $0x248] sm:$0xf]  ;;  %v923_v32 = vperm.slane %v4158_v45, 5 }
 0x15b   :  { %1581 = vmatmul.bf16.vlgmr.msra.gmra.mxu1 %v3925_v56  ;;  %1607 = vmatmul.bf16.vlgmr.msra.gmra.mxu3 %v3925_v56  ;;  %v2433_v37 = vor.u32 %v2746_v36, %v2432_v35 }
 0x15c   :  { %1620 = vmatmul.bf16.vlgmr.msrb.gmra.mxu0 %v3864_v17 }
 0x15d   :  { %1664 = vmatpush.bf16.msra.mxu0 %v2349_v38  ;;  %1629 = vmatpush.bf16.msrb.mxu1 %v2453_v43  ;;  %v2404_v38 = vld [vmem:[%s4175_s5 + $0x210] sm:$0xf] }
 0x15e   :  { %1646 = vmatmul.bf16.vlgmr.msrb.gmra.mxu2 %v3864_v17  ;;  %1655 = vmatpush.bf16.msrb.mxu3 %v2457_v44  ;;  %v2405_v40 = vor.u32 %v2739_v39, %v2404_v38 }
 0x161   :  { %1665 = vmatpush.bf16.msra.mxu0 %v2321_v48  ;;  %1630 = vmatpush.bf16.msrb.mxu1 %v2425_v54  ;;  %v918_v48 = vperm.slane %v4158_v45, 0 }
 0x162   :  { %1656 = vmatpush.bf16.msrb.mxu3 %v2429_v55 }
 0x165   :  { %1666 = vmatpush.bf16.msra.mxu0 %v2293_v57  ;;  %1631 = vmatpush.bf16.msrb.mxu1 %v2397_v62 }
 0x166   :  { %1657 = vmatpush.bf16.msrb.mxu3 %v2401_v63  ;;  %v920_v63 = vperm.slane %v4158_v45, 2 }
 0x169   :  { %1667 = vmatpush.bf16.msra.mxu0 %v2265_v3  ;;  %1632 = vmatpush.bf16.msrb.mxu1 %v2369_v9 }
 0x16a   :  { %1658 = vmatpush.bf16.msrb.mxu3 %v2373_v10  ;;  %v921_v10 = vperm.slane %v4158_v45, 3 }
 0x16c   :  { %1633 = vmatmul.bf16.vlgmr.msrb.gmra.mxu1 %v3925_v56 }
 0x16d   :  { %1677 = vmatpush.bf16.msra.mxu1 %v2573_v11  ;;  %1668 = vmatpush.bf16.msra.mxu0 %v2237_v12 }
 0x16e   :  { %1659 = vmatmul.bf16.vlgmr.msrb.gmra.mxu3 %v3925_v56 }
 0x171   :  { %1678 = vmatpush.bf16.msra.mxu1 %v2545_v18  ;;  %1669 = vmatpush.bf16.msra.mxu0 %v2209_v19 }
 0x175   :  { %1679 = vmatpush.bf16.msra.mxu1 %v2517_v24  ;;  %1670 = vmatpush.bf16.msra.mxu0 %v2181_v25 }
 0x179   :  { %1680 = vmatpush.bf16.msra.mxu1 %v2489_v30  ;;  %1671 = vmatpush.bf16.msra.mxu0 %v2153_v31 }
 0x17c   :  { %1672 = vmatmul.bf16.vlgmr.msra.gmra.mxu0 %v3864_v17  ;;  %v2732_v17 = vld [vmem:[%s4175_s5 + $0x1f0] sm:$0xf0]  ;;  %s2823_s5 = smov [#allocation2]  }
 0x17d   :  { %1681 = vmatpush.bf16.msra.mxu1 %v2461_v34  ;;  %v2377_v42 = vor.u32 %v2732_v17, %v2376_v41  ;;  %s1731_s6 = sshll.u32 %s2823_s5, 4  ;;  %s1732_s6 = int_to_ptr.vmem [resolvable:$true] %s1731_s6 }
 0x181   :  { %1682 = vmatpush.bf16.msra.mxu1 %v2433_v37 }
 0x185   :  { %1683 = vmatpush.bf16.msra.mxu1 %v2405_v40 }
 0x189   :  { %1684 = vmatpush.bf16.msra.mxu1 %v2377_v42 }
 0x18c   :  { %1685 = vmatmul.bf16.vlgmr.msra.gmra.mxu1 %v3925_v56 }
 0x1b8   :  { %v1517_v43 = vpop.f32.mrf.mxu0 }
 0x1b9   :  { %v1518_v50 = vadd.f32 %v1517_v43, %v918_v48 }
 0x1be   :  { %v1543_v44 = vpop.f32.mrf.mxu2 }
 0x1bf   :  { %v1544_v51 = vadd.f32 %v1543_v44, %v919_v53 }
 0x1c0   :  { %v1519_v46 = vpop.f32.mrf.mxu0 }
 0x1c6   :  { %v1545_v49 = vpop.f32.mrf.mxu2 }
 0x1c8   :  { %v1530_v52 = vpop.f32.mrf.mxu1 }
 0x1c9   :  { %v1531_v54 = vadd.f32 %v1530_v52, %v1518_v50  ;;  %v1569_v55 = vpop.f32.mrf.mxu0  ;;  %v924_v50 = vperm.slane %v4158_v45, 6 }
 0x1ca   :  { %v1570_v3 = vadd.f32 %v1569_v55, %v920_v63 }
 0x1cb   :  { %v1690_v47 = vmul.f32 0.5, %v1531_v54 }
 0x1cd   :  { %2783 = vtanh.f32 %v1690_v47 }
 0x1ce   :  { %v1556_v56 = vpop.f32.mrf.mxu3 }
 0x1cf   :  { %v1557_v57 = vadd.f32 %v1556_v56, %v1544_v51  ;;  %v1595_v58 = vpop.f32.mrf.mxu2 }
 0x1d0   :  { %v1532_v59 = vpop.f32.mrf.mxu1  ;;  %v1596_v13 = vadd.f32 %v1595_v58, %v921_v10 }
 0x1d1   :  { %v1691_v60 = vmul.f32 0.5, %v1557_v57  ;;  %v1571_v61 = vpop.f32.mrf.mxu0 }
 0x1d3   :  { %v2784_v62 = vpop.eup %2783  ;;  %2785 = vtanh.f32 %v1691_v60 }
 0x1d4   :  { %v1704_v0 = vadd.f32 1.0, %v2784_v62 }
 0x1d6   :  { %v1711_v1 = vmul.f32 0.5, %v1704_v0  ;;  %v1558_v2 = vpop.f32.mrf.mxu3 }
 0x1d7   :  { %v1597_v4 = vpop.f32.mrf.mxu2 }
 0x1d8   :  { %1718 = vst [vmem:[#allocation2] sm:$0xff] %v1711_v1  ;;  %v1582_v5 = vpop.f32.mrf.mxu1 }
 0x1d9   :  { %v2786_v6 = vpop.eup %2785  ;;  %v1583_v7 = vadd.f32 %v1582_v5, %v1570_v3  ;;  %v1621_v8 = vpop.f32.mrf.mxu0 }
 0x1da   :  { %v1705_v9 = vadd.f32 1.0, %v2786_v6  ;;  %v1622_v26 = vadd.f32 %v1621_v8, %v922_v23 }
 0x1db   :  { %v1692_v11 = vmul.f32 0.5, %v1583_v7 }
 0x1dc   :  { %v1712_v12 = vmul.f32 0.5, %v1705_v9 }
 0x1dd   :  { %2787 = vtanh.f32 %v1692_v11 }
 0x1de   :  { %1719 = vst [vmem:[#allocation2 + $0x8] sm:$0xff] %v1712_v12  ;;  %v1608_v14 = vpop.f32.mrf.mxu3 }
 0x1df   :  { %v1609_v15 = vadd.f32 %v1608_v14, %v1596_v13 }
 0x1e0   :  { %v1584_v18 = vpop.f32.mrf.mxu1 }
 0x1e1   :  { %v1647_v16 = vpop.f32.mrf.mxu2  ;;  %v1623_v19 = vpop.f32.mrf.mxu0  ;;  %v1693_v20 = vmul.f32 0.5, %v1609_v15 }
 0x1e2   :  { %v1648_v35 = vadd.f32 %v1647_v16, %v923_v32 }
 0x1e3   :  { %v2788_v21 = vpop.eup %2787  ;;  %2789 = vtanh.f32 %v1693_v20 }
 0x1e4   :  { %v1706_v22 = vadd.f32 1.0, %v2788_v21 }
 0x1e6   :  { %v1713_v24 = vmul.f32 0.5, %v1706_v22  ;;  %v1610_v25 = vpop.f32.mrf.mxu3 }
 0x1e8   :  { %1720 = vst [vmem:[#allocation2 + $0x10] sm:$0xff] %v1713_v24 }
 0x1e9   :  { %v1649_v27 = vpop.f32.mrf.mxu2  ;;  %v1634_v28 = vpop.f32.mrf.mxu1 }
 0x1ea   :  { %v2790_v29 = vpop.eup %2789  ;;  %v1635_v30 = vadd.f32 %v1634_v28, %v1622_v26 }
 0x1eb   :  { %v1707_v31 = vadd.f32 1.0, %v2790_v29 }
 0x1ec   :  { %v1694_v33 = vmul.f32 0.5, %v1635_v30 }
 0x1ed   :  { %v1714_v34 = vmul.f32 0.5, %v1707_v31 }
 0x1ee   :  { %2791 = vtanh.f32 %v1694_v33 }
 0x1ef   :  { %1721 = vst [vmem:[#allocation2 + $0x18] sm:$0xff] %v1714_v34 }
 0x1f1   :  { %v1660_v36 = vpop.f32.mrf.mxu3  ;;  %v1636_v38 = vpop.f32.mrf.mxu1 }
 0x1f2   :  { %v1661_v37 = vadd.f32 %v1660_v36, %v1648_v35 }
 0x1f4   :  { %v1695_v39 = vmul.f32 0.5, %v1661_v37  ;;  %v2792_v40 = vpop.eup %2791 }
 0x1f5   :  { %v1708_v41 = vadd.f32 1.0, %v2792_v40 }
 0x1f6   :  { %2793 = vtanh.f32 %v1695_v39 }
 0x1f7   :  { %v1715_v17 = vmul.f32 0.5, %v1708_v41 }
 0x1f9   :  { %v1673_v42 = vpop.f32.mrf.mxu0  ;;  %v1662_v43 = vpop.f32.mrf.mxu3  ;;  %1722 = vst [vmem:[#allocation2 + $0x20] sm:$0xff] %v1715_v17 }
 0x1fa   :  { %v1674_v52 = vadd.f32 %v1673_v42, %v924_v50 }
 0x1fc   :  { %v2794_v44 = vpop.eup %2793 }
 0x1fd   :  { %v1709_v46 = vadd.f32 1.0, %v2794_v44 }
 0x1ff   :  { %v1716_v48 = vmul.f32 0.5, %v1709_v46 }
 0x201   :  { %v1675_v49 = vpop.f32.mrf.mxu0  ;;  %1723 = vst [vmem:[#allocation2 + $0x28] sm:$0xff] %v1716_v48 }
 0x209   :  { %v1686_v53 = vpop.f32.mrf.mxu1 }
 0x20a   :  { %v1687_v54 = vadd.f32 %v1686_v53, %v1674_v52 }
 0x20c   :  { %v1696_v55 = vmul.f32 0.5, %v1687_v54 }
 0x20e   :  { %2795 = vtanh.f32 %v1696_v55 }
 0x211   :  { %v1688_v47 = vpop.f32.mrf.mxu1 }
 0x214   :  { %v2796_v51 = vpop.eup %2795 }
 0x215   :  { %v1710_v56 = vadd.f32 1.0, %v2796_v51 }
 0x217   :  { %v1717_v57 = vmul.f32 0.5, %v1710_v56 }
 0x219   :  { %1725 = vst.msk [vmem:[#allocation2 + $0x30] sm:$0xff] %vm1724_vm0, %v1717_v57 }
 0x21a   :  { %1736 = dma.vmem_to_hbm [thread:$0]  %s1732_s6, 896, %s1734_s12, [#allocation3]  }
 0x21b   :  { %2821 = dma.done.wait [#allocation3], 896  }
 0x21c   :  { %2822 = vsyncadd [#allocation3], 4294966400 }
 0x21d   :  { %1741 = vsyncpa [#allocation3], 1 }

</bundles_post_ra>
